<compile_context>
chip_gen: v7x
topology: tpu7x:2x2x1
jax: 0.10.0
libtpu: 0.0.40
codegen_flags: <defaults>
</compile_context>

<pallas_src>
import functools

import jax
import jax.numpy as jnp
from jax.experimental import pallas as pl
from jax.experimental.pallas import tpu as pltpu


def _relu_conv_kernel(x_ref, w_ref, o_ref, *, kh_total, kw_total, c_in, c_out,
                      w_out, stride, h_blk, lanes, n_acc):
    """One (batch, H-block) step of Conv2d(bias=False) + ReLU.

    x_ref: (1, Q, Hs, Ws)    phase-decomposed zero-padded input, Q = stride^2*C_in
                             x_ref[0, (ph*stride+pw)*C_in+ci, i, j]
                               = x_pad[ci, i*stride+ph, j*stride+pw]
    w_ref: (R, lanes)        dense co-major weights, lanes = C_out*W_out,
                             w_ref[r, co*W_out + w] = W[kh, kw, ci, co]
    o_ref: (1, h_blk, lanes) lane-dense output rows of this H-block
    """
    # Output-row offset of this H-block.  Stride is absorbed by the phase
    # decomposition, so output row h needs phase-slab row h + kh//stride.
    h0 = pl.multiple_of(pl.program_id(1) * h_blk, h_blk)

    # Independent partial accumulators break the R-deep dependent add chain
    # (n_acc * (h_blk, lanes) f32 is only a handful of vregs, no spill).
    accs = [jnp.zeros((h_blk, lanes), jnp.float32) for _ in range(n_acc)]

    r = 0
    for kh in range(kh_total):
        for kw in range(kw_total):
            q = ((kh % stride) * stride + (kw % stride)) * c_in
            dh, dw = kh // stride, kw // stride
            for ci in range(c_in):
                # (h_blk, W_out) tap: unit-stride slice of the padded input.
                tap = x_ref[0, q + ci, pl.ds(h0 + dh, h_blk), dw:dw + w_out]
                tap = tap.astype(jnp.float32)
                # C_out lane broadcast: co-major layout makes this a cheap XLU
                # lane copy of a W_out-wide segment (no data from HBM).
                tap_l = jnp.concatenate([tap] * c_out, axis=1)  # (h_blk, lanes)
                w_row = w_ref[r:r + 1, :].astype(jnp.float32)   # (1, lanes)
                accs[r % n_acc] = accs[r % n_acc] + tap_l * w_row
                r += 1

    acc = accs[0]
    for a in accs[1:]:
        acc = acc + a
    o_ref[0] = jnp.maximum(acc, 0.0).astype(o_ref.dtype)  # fused ReLU


def relu_conv(x_nchw, w_oihw, *, stride, padding):
    """Conv2d(C_in->C_out, k, stride, padding, bias=False) followed by ReLU."""
    n, c_in, h, w_in = x_nchw.shape
    c_out, _, kh_total, kw_total = w_oihw.shape
    h_out = (h + 2 * padding - kh_total) // stride + 1
    w_out = (w_in + 2 * padding - kw_total) // stride + 1
    lanes = c_out * w_out
    r_total = kh_total * kw_total * c_in

    # ---- wrapper glue is now O(input bytes): pad, (optionally) phase-split.
    hs = (kh_total - 1) // stride + h_out
    ws = (kw_total - 1) // stride + w_out
    tot_h, tot_w = stride * hs, stride * ws
    x_pad = jnp.pad(
        x_nchw,
        ((0, 0), (0, 0),
         (padding, max(0, tot_h - h - padding)),
         (padding, max(0, tot_w - w_in - padding))),
    )[:, :, :tot_h, :tot_w]
    if stride == 1:
        x_ph = x_pad                                    # (N, C_in, Hs, Ws)
    else:
        phases = [x_pad[:, :, ph::stride, pw::stride]
                  for ph in range(stride) for pw in range(stride)]
        x_ph = jnp.stack(phases, axis=1).reshape(
            n, stride * stride * c_in, hs, ws)
    q_total = x_ph.shape[1]

    # Dense co-major weights: (R, C_out*W_out), kept in the activation dtype
    # (in-kernel f32 upcast); w_lanes[r, co*W_out + w] = W[kh, kw, ci, co].
    w_r = jnp.transpose(w_oihw, (2, 3, 1, 0)).reshape(r_total, c_out)
    w_lanes = jnp.repeat(w_r, w_out, axis=1).astype(x_nchw.dtype)

    h_blk = 8 if h_out % 8 == 0 else h_out   # sublane-aligned H blocks
    n_hb = h_out // h_blk
    n_acc = min(4, r_total)

    kernel = functools.partial(
        _relu_conv_kernel, kh_total=kh_total, kw_total=kw_total, c_in=c_in,
        c_out=c_out, w_out=w_out, stride=stride, h_blk=h_blk, lanes=lanes,
        n_acc=n_acc)

    out_lane = pl.pallas_call(
        kernel,
        out_shape=jax.ShapeDtypeStruct((n, h_out, lanes), x_nchw.dtype),
        grid_spec=pltpu.PrefetchScalarGridSpec(
            num_scalar_prefetch=0,
            grid=(n, n_hb),
            in_specs=[
                pl.BlockSpec((1, q_total, hs, ws), lambda b, hb: (b, 0, 0, 0)),
                pl.BlockSpec((r_total, lanes), lambda b, hb: (0, 0)),
            ],
            out_specs=pl.BlockSpec((1, h_blk, lanes), lambda b, hb: (b, hb, 0)),
        ),
        compiler_params=pltpu.CompilerParams(
            dimension_semantics=("parallel", "parallel")),
    )(x_ph, w_lanes)

    # lane-dense (N, H_out, C_out*W_out) -> NCHW
    out = out_lane.reshape(n, h_out, c_out, w_out)
    return jnp.transpose(out, (0, 2, 1, 3))


if __name__ == "__main__":
    # Module config: ReLUConv(C_in=4, C_out=8, kernel_size=3, stride=1, padding=1)
    C_in, C_out, K, STRIDE, PAD = 4, 8, 3, 1, 1
    N, H, W = 2, 16, 16

    key = jax.random.PRNGKey(0)
    kx, kw = jax.random.split(key)
    x = jax.random.normal(kx, (N, C_in, H, W), dtype=jnp.float32)
    fan_in = C_in * K * K
    w = jax.random.normal(kw, (C_out, C_in, K, K), dtype=jnp.float32) * (
        (2.0 / fan_in) ** 0.5
    )

    out = relu_conv(x, w, stride=STRIDE, padding=PAD)
    out = jax.block_until_ready(out)

    # Reference: XLA conv + ReLU, same semantics as nn.Conv2d(bias=False)+ReLU.
    ref = jax.lax.conv_general_dilated(
        x, w,
        window_strides=(STRIDE, STRIDE),
        padding=[(PAD, PAD), (PAD, PAD)],
        dimension_numbers=("NCHW", "OIHW", "NCHW"),
    )
    ref = jnp.maximum(ref, 0.0)

    assert out.shape == ref.shape == (N, C_out, H, W)
    if not jnp.allclose(out, ref, atol=1e-5, rtol=1e-5):
        raise AssertionError("Pallas ReLUConv mismatch vs XLA reference")

    print("KERNEL_OK")
</pallas_src>

<mosaic_0001>
module attributes {stable_mosaic.version = 11 : i64} {
  func.func @_relu_conv_kernel(%arg0: i32, %arg1: i32, %arg2: memref<1x4x18x18xf32, #tpu.memory_space<vmem>>, %arg3: memref<36x128xf32, #tpu.memory_space<vmem>>, %arg4: memref<1x8x128xf32, #tpu.memory_space<vmem>>) attributes {dimension_semantics = [#tpu.dimension_semantics<parallel>, #tpu.dimension_semantics<parallel>], iteration_bounds = array<i64: 2, 2>, scalar_prefetch = 0 : i64, scratch_operands = 0 : i64, tpu.core_type = #tpu.core_type<tc>, window_params = [{transform_indices = @transform_0, window_bounds = array<i64: 1, 4, 18, 18>}, {pipeline_mode = #tpu.pipeline_mode<synchronous>, transform_indices = @transform_1, window_bounds = array<i64: 36, 128>}, {transform_indices = @transform_2, window_bounds = array<i64: 1, 8, 128>}]} {
    %c8_i32 = arith.constant 8 : i32
    %0 = arith.muli %arg1, %c8_i32 : i32
    %1 = tpu.assume_multiple %0, 8 : i32
    %cst = arith.constant 0.000000e+00 : f32
    %2 = vector.broadcast %cst : f32 to vector<8x128xf32>
    %cst_0 = arith.constant 0.000000e+00 : f32
    %3 = vector.broadcast %cst_0 : f32 to vector<8x128xf32>
    %cst_1 = arith.constant 0.000000e+00 : f32
    %4 = vector.broadcast %cst_1 : f32 to vector<8x128xf32>
    %cst_2 = arith.constant 0.000000e+00 : f32
    %5 = vector.broadcast %cst_2 : f32 to vector<8x128xf32>
    %c0_i32 = arith.constant 0 : i32
    %6 = arith.addi %1, %c0_i32 : i32
    %c0 = arith.constant 0 : index
    %c0_3 = arith.constant 0 : index
    %7 = arith.index_cast %6 : i32 to index
    %c0_4 = arith.constant 0 : index
    %8 = vector.load %arg2[%c0, %c0_3, %7, %c0_4] : memref<1x4x18x18xf32, #tpu.memory_space<vmem>>, vector<1x1x8x16xf32>
    %9 = vector.shape_cast %8 : vector<1x1x8x16xf32> to vector<8x16xf32>
    %10 = tpu.concatenate %9, %9, %9, %9, %9, %9, %9, %9 in 1 : vector<8x16xf32>, vector<8x16xf32>, vector<8x16xf32>, vector<8x16xf32>, vector<8x16xf32>, vector<8x16xf32>, vector<8x16xf32>, vector<8x16xf32> -> vector<8x128xf32>
    %c0_5 = arith.constant 0 : index
    %c0_6 = arith.constant 0 : index
    %11 = vector.load %arg3[%c0_5, %c0_6] : memref<36x128xf32, #tpu.memory_space<vmem>>, vector<1x128xf32>
    %12 = vector.broadcast %11 : vector<1x128xf32> to vector<8x128xf32>
    %13 = arith.mulf %10, %12 : vector<8x128xf32>
    %14 = arith.addf %2, %13 : vector<8x128xf32>
    %c0_i32_7 = arith.constant 0 : i32
    %15 = arith.addi %1, %c0_i32_7 : i32
    %c0_8 = arith.constant 0 : index
    %c1 = arith.constant 1 : index
    %16 = arith.index_cast %15 : i32 to index
    %c0_9 = arith.constant 0 : index
    %17 = vector.load %arg2[%c0_8, %c1, %16, %c0_9] : memref<1x4x18x18xf32, #tpu.memory_space<vmem>>, vector<1x1x8x16xf32>
    %18 = vector.shape_cast %17 : vector<1x1x8x16xf32> to vector<8x16xf32>
    %19 = tpu.concatenate %18, %18, %18, %18, %18, %18, %18, %18 in 1 : vector<8x16xf32>, vector<8x16xf32>, vector<8x16xf32>, vector<8x16xf32>, vector<8x16xf32>, vector<8x16xf32>, vector<8x16xf32>, vector<8x16xf32> -> vector<8x128xf32>
    %c1_10 = arith.constant 1 : index
    %c0_11 = arith.constant 0 : index
    %20 = vector.load %arg3[%c1_10, %c0_11] : memref<36x128xf32, #tpu.memory_space<vmem>>, vector<1x128xf32>
    %21 = vector.broadcast %20 : vector<1x128xf32> to vector<8x128xf32>
    %22 = arith.mulf %19, %21 : vector<8x128xf32>
    %23 = arith.addf %3, %22 : vector<8x128xf32>
    %c0_i32_12 = arith.constant 0 : i32
    %24 = arith.addi %1, %c0_i32_12 : i32
    %c0_13 = arith.constant 0 : index
    %c2 = arith.constant 2 : index
    %25 = arith.index_cast %24 : i32 to index
    %c0_14 = arith.constant 0 : index
    %26 = vector.load %arg2[%c0_13, %c2, %25, %c0_14] : memref<1x4x18x18xf32, #tpu.memory_space<vmem>>, vector<1x1x8x16xf32>
    %27 = vector.shape_cast %26 : vector<1x1x8x16xf32> to vector<8x16xf32>
    %28 = tpu.concatenate %27, %27, %27, %27, %27, %27, %27, %27 in 1 : vector<8x16xf32>, vector<8x16xf32>, vector<8x16xf32>, vector<8x16xf32>, vector<8x16xf32>, vector<8x16xf32>, vector<8x16xf32>, vector<8x16xf32> -> vector<8x128xf32>
    %c2_15 = arith.constant 2 : index
    %c0_16 = arith.constant 0 : index
    %29 = vector.load %arg3[%c2_15, %c0_16] : memref<36x128xf32, #tpu.memory_space<vmem>>, vector<1x128xf32>
    %30 = vector.broadcast %29 : vector<1x128xf32> to vector<8x128xf32>
    %31 = arith.mulf %28, %30 : vector<8x128xf32>
    %32 = arith.addf %4, %31 : vector<8x128xf32>
    %c0_i32_17 = arith.constant 0 : i32
    %33 = arith.addi %1, %c0_i32_17 : i32
    %c0_18 = arith.constant 0 : index
    %c3 = arith.constant 3 : index
    %34 = arith.index_cast %33 : i32 to index
    %c0_19 = arith.constant 0 : index
    %35 = vector.load %arg2[%c0_18, %c3, %34, %c0_19] : memref<1x4x18x18xf32, #tpu.memory_space<vmem>>, vector<1x1x8x16xf32>
    %36 = vector.shape_cast %35 : vector<1x1x8x16xf32> to vector<8x16xf32>
    %37 = tpu.concatenate %36, %36, %36, %36, %36, %36, %36, %36 in 1 : vector<8x16xf32>, vector<8x16xf32>, vector<8x16xf32>, vector<8x16xf32>, vector<8x16xf32>, vector<8x16xf32>, vector<8x16xf32>, vector<8x16xf32> -> vector<8x128xf32>
    %c3_20 = arith.constant 3 : index
    %c0_21 = arith.constant 0 : index
    %38 = vector.load %arg3[%c3_20, %c0_21] : memref<36x128xf32, #tpu.memory_space<vmem>>, vector<1x128xf32>
    %39 = vector.broadcast %38 : vector<1x128xf32> to vector<8x128xf32>
    %40 = arith.mulf %37, %39 : vector<8x128xf32>
    %41 = arith.addf %5, %40 : vector<8x128xf32>
    %c0_i32_22 = arith.constant 0 : i32
    %42 = arith.addi %1, %c0_i32_22 : i32
    %c0_23 = arith.constant 0 : index
    %c0_24 = arith.constant 0 : index
    %43 = arith.index_cast %42 : i32 to index
    %c1_25 = arith.constant 1 : index
    %44 = vector.load %arg2[%c0_23, %c0_24, %43, %c1_25] : memref<1x4x18x18xf32, #tpu.memory_space<vmem>>, vector<1x1x8x16xf32>
    %45 = vector.shape_cast %44 : vector<1x1x8x16xf32> to vector<8x16xf32>
    %46 = tpu.concatenate %45, %45, %45, %45, %45, %45, %45, %45 in 1 : vector<8x16xf32>, vector<8x16xf32>, vector<8x16xf32>, vector<8x16xf32>, vector<8x16xf32>, vector<8x16xf32>, vector<8x16xf32>, vector<8x16xf32> -> vector<8x128xf32>
    %c4 = arith.constant 4 : index
    %c0_26 = arith.constant 0 : index
    %47 = vector.load %arg3[%c4, %c0_26] : memref<36x128xf32, #tpu.memory_space<vmem>>, vector<1x128xf32>
    %48 = vector.broadcast %47 : vector<1x128xf32> to vector<8x128xf32>
    %49 = arith.mulf %46, %48 : vector<8x128xf32>
    %50 = arith.addf %14, %49 : vector<8x128xf32>
    %c0_i32_27 = arith.constant 0 : i32
    %51 = arith.addi %1, %c0_i32_27 : i32
    %c0_28 = arith.constant 0 : index
    %c1_29 = arith.constant 1 : index
    %52 = arith.index_cast %51 : i32 to index
    %c1_30 = arith.constant 1 : index
    %53 = vector.load %arg2[%c0_28, %c1_29, %52, %c1_30] : memref<1x4x18x18xf32, #tpu.memory_space<vmem>>, vector<1x1x8x16xf32>
    %54 = vector.shape_cast %53 : vector<1x1x8x16xf32> to vector<8x16xf32>
    %55 = tpu.concatenate %54, %54, %54, %54, %54, %54, %54, %54 in 1 : vector<8x16xf32>, vector<8x16xf32>, vector<8x16xf32>, vector<8x16xf32>, vector<8x16xf32>, vector<8x16xf32>, vector<8x16xf32>, vector<8x16xf32> -> vector<8x128xf32>
    %c5 = arith.constant 5 : index
    %c0_31 = arith.constant 0 : index
    %56 = vector.load %arg3[%c5, %c0_31] : memref<36x128xf32, #tpu.memory_space<vmem>>, vector<1x128xf32>
    %57 = vector.broadcast %56 : vector<1x128xf32> to vector<8x128xf32>
    %58 = arith.mulf %55, %57 : vector<8x128xf32>
    %59 = arith.addf %23, %58 : vector<8x128xf32>
    %c0_i32_32 = arith.constant 0 : i32
    %60 = arith.addi %1, %c0_i32_32 : i32
    %c0_33 = arith.constant 0 : index
    %c2_34 = arith.constant 2 : index
    %61 = arith.index_cast %60 : i32 to index
    %c1_35 = arith.constant 1 : index
    %62 = vector.load %arg2[%c0_33, %c2_34, %61, %c1_35] : memref<1x4x18x18xf32, #tpu.memory_space<vmem>>, vector<1x1x8x16xf32>
    %63 = vector.shape_cast %62 : vector<1x1x8x16xf32> to vector<8x16xf32>
    %64 = tpu.concatenate %63, %63, %63, %63, %63, %63, %63, %63 in 1 : vector<8x16xf32>, vector<8x16xf32>, vector<8x16xf32>, vector<8x16xf32>, vector<8x16xf32>, vector<8x16xf32>, vector<8x16xf32>, vector<8x16xf32> -> vector<8x128xf32>
    %c6 = arith.constant 6 : index
    %c0_36 = arith.constant 0 : index
    %65 = vector.load %arg3[%c6, %c0_36] : memref<36x128xf32, #tpu.memory_space<vmem>>, vector<1x128xf32>
    %66 = vector.broadcast %65 : vector<1x128xf32> to vector<8x128xf32>
    %67 = arith.mulf %64, %66 : vector<8x128xf32>
    %68 = arith.addf %32, %67 : vector<8x128xf32>
    %c0_i32_37 = arith.constant 0 : i32
    %69 = arith.addi %1, %c0_i32_37 : i32
    %c0_38 = arith.constant 0 : index
    %c3_39 = arith.constant 3 : index
    %70 = arith.index_cast %69 : i32 to index
    %c1_40 = arith.constant 1 : index
    %71 = vector.load %arg2[%c0_38, %c3_39, %70, %c1_40] : memref<1x4x18x18xf32, #tpu.memory_space<vmem>>, vector<1x1x8x16xf32>
    %72 = vector.shape_cast %71 : vector<1x1x8x16xf32> to vector<8x16xf32>
    %73 = tpu.concatenate %72, %72, %72, %72, %72, %72, %72, %72 in 1 : vector<8x16xf32>, vector<8x16xf32>, vector<8x16xf32>, vector<8x16xf32>, vector<8x16xf32>, vector<8x16xf32>, vector<8x16xf32>, vector<8x16xf32> -> vector<8x128xf32>
    %c7 = arith.constant 7 : index
    %c0_41 = arith.constant 0 : index
    %74 = vector.load %arg3[%c7, %c0_41] : memref<36x128xf32, #tpu.memory_space<vmem>>, vector<1x128xf32>
    %75 = vector.broadcast %74 : vector<1x128xf32> to vector<8x128xf32>
    %76 = arith.mulf %73, %75 : vector<8x128xf32>
    %77 = arith.addf %41, %76 : vector<8x128xf32>
    %c0_i32_42 = arith.constant 0 : i32
    %78 = arith.addi %1, %c0_i32_42 : i32
    %c0_43 = arith.constant 0 : index
    %c0_44 = arith.constant 0 : index
    %79 = arith.index_cast %78 : i32 to index
    %c2_45 = arith.constant 2 : index
    %80 = vector.load %arg2[%c0_43, %c0_44, %79, %c2_45] : memref<1x4x18x18xf32, #tpu.memory_space<vmem>>, vector<1x1x8x16xf32>
    %81 = vector.shape_cast %80 : vector<1x1x8x16xf32> to vector<8x16xf32>
    %82 = tpu.concatenate %81, %81, %81, %81, %81, %81, %81, %81 in 1 : vector<8x16xf32>, vector<8x16xf32>, vector<8x16xf32>, vector<8x16xf32>, vector<8x16xf32>, vector<8x16xf32>, vector<8x16xf32>, vector<8x16xf32> -> vector<8x128xf32>
    %c8 = arith.constant 8 : index
    %c0_46 = arith.constant 0 : index
    %83 = vector.load %arg3[%c8, %c0_46] : memref<36x128xf32, #tpu.memory_space<vmem>>, vector<1x128xf32>
    %84 = vector.broadcast %83 : vector<1x128xf32> to vector<8x128xf32>
    %85 = arith.mulf %82, %84 : vector<8x128xf32>
    %86 = arith.addf %50, %85 : vector<8x128xf32>
    %c0_i32_47 = arith.constant 0 : i32
    %87 = arith.addi %1, %c0_i32_47 : i32
    %c0_48 = arith.constant 0 : index
    %c1_49 = arith.constant 1 : index
    %88 = arith.index_cast %87 : i32 to index
    %c2_50 = arith.constant 2 : index
    %89 = vector.load %arg2[%c0_48, %c1_49, %88, %c2_50] : memref<1x4x18x18xf32, #tpu.memory_space<vmem>>, vector<1x1x8x16xf32>
    %90 = vector.shape_cast %89 : vector<1x1x8x16xf32> to vector<8x16xf32>
    %91 = tpu.concatenate %90, %90, %90, %90, %90, %90, %90, %90 in 1 : vector<8x16xf32>, vector<8x16xf32>, vector<8x16xf32>, vector<8x16xf32>, vector<8x16xf32>, vector<8x16xf32>, vector<8x16xf32>, vector<8x16xf32> -> vector<8x128xf32>
    %c9 = arith.constant 9 : index
    %c0_51 = arith.constant 0 : index
    %92 = vector.load %arg3[%c9, %c0_51] : memref<36x128xf32, #tpu.memory_space<vmem>>, vector<1x128xf32>
    %93 = vector.broadcast %92 : vector<1x128xf32> to vector<8x128xf32>
    %94 = arith.mulf %91, %93 : vector<8x128xf32>
    %95 = arith.addf %59, %94 : vector<8x128xf32>
    %c0_i32_52 = arith.constant 0 : i32
    %96 = arith.addi %1, %c0_i32_52 : i32
    %c0_53 = arith.constant 0 : index
    %c2_54 = arith.constant 2 : index
    %97 = arith.index_cast %96 : i32 to index
    %c2_55 = arith.constant 2 : index
    %98 = vector.load %arg2[%c0_53, %c2_54, %97, %c2_55] : memref<1x4x18x18xf32, #tpu.memory_space<vmem>>, vector<1x1x8x16xf32>
    %99 = vector.shape_cast %98 : vector<1x1x8x16xf32> to vector<8x16xf32>
    %100 = tpu.concatenate %99, %99, %99, %99, %99, %99, %99, %99 in 1 : vector<8x16xf32>, vector<8x16xf32>, vector<8x16xf32>, vector<8x16xf32>, vector<8x16xf32>, vector<8x16xf32>, vector<8x16xf32>, vector<8x16xf32> -> vector<8x128xf32>
    %c10 = arith.constant 10 : index
    %c0_56 = arith.constant 0 : index
    %101 = vector.load %arg3[%c10, %c0_56] : memref<36x128xf32, #tpu.memory_space<vmem>>, vector<1x128xf32>
    %102 = vector.broadcast %101 : vector<1x128xf32> to vector<8x128xf32>
    %103 = arith.mulf %100, %102 : vector<8x128xf32>
    %104 = arith.addf %68, %103 : vector<8x128xf32>
    %c0_i32_57 = arith.constant 0 : i32
    %105 = arith.addi %1, %c0_i32_57 : i32
    %c0_58 = arith.constant 0 : index
    %c3_59 = arith.constant 3 : index
    %106 = arith.index_cast %105 : i32 to index
    %c2_60 = arith.constant 2 : index
    %107 = vector.load %arg2[%c0_58, %c3_59, %106, %c2_60] : memref<1x4x18x18xf32, #tpu.memory_space<vmem>>, vector<1x1x8x16xf32>
    %108 = vector.shape_cast %107 : vector<1x1x8x16xf32> to vector<8x16xf32>
    %109 = tpu.concatenate %108, %108, %108, %108, %108, %108, %108, %108 in 1 : vector<8x16xf32>, vector<8x16xf32>, vector<8x16xf32>, vector<8x16xf32>, vector<8x16xf32>, vector<8x16xf32>, vector<8x16xf32>, vector<8x16xf32> -> vector<8x128xf32>
    %c11 = arith.constant 11 : index
    %c0_61 = arith.constant 0 : index
    %110 = vector.load %arg3[%c11, %c0_61] : memref<36x128xf32, #tpu.memory_space<vmem>>, vector<1x128xf32>
    %111 = vector.broadcast %110 : vector<1x128xf32> to vector<8x128xf32>
    %112 = arith.mulf %109, %111 : vector<8x128xf32>
    %113 = arith.addf %77, %112 : vector<8x128xf32>
    %c1_i32 = arith.constant 1 : i32
    %114 = arith.addi %1, %c1_i32 : i32
    %c0_62 = arith.constant 0 : index
    %c0_63 = arith.constant 0 : index
    %115 = arith.index_cast %114 : i32 to index
    %c0_64 = arith.constant 0 : index
    %116 = vector.load %arg2[%c0_62, %c0_63, %115, %c0_64] : memref<1x4x18x18xf32, #tpu.memory_space<vmem>>, vector<1x1x8x16xf32>
    %117 = vector.shape_cast %116 : vector<1x1x8x16xf32> to vector<8x16xf32>
    %118 = tpu.concatenate %117, %117, %117, %117, %117, %117, %117, %117 in 1 : vector<8x16xf32>, vector<8x16xf32>, vector<8x16xf32>, vector<8x16xf32>, vector<8x16xf32>, vector<8x16xf32>, vector<8x16xf32>, vector<8x16xf32> -> vector<8x128xf32>
    %c12 = arith.constant 12 : index
    %c0_65 = arith.constant 0 : index
    %119 = vector.load %arg3[%c12, %c0_65] : memref<36x128xf32, #tpu.memory_space<vmem>>, vector<1x128xf32>
    %120 = vector.broadcast %119 : vector<1x128xf32> to vector<8x128xf32>
    %121 = arith.mulf %118, %120 : vector<8x128xf32>
    %122 = arith.addf %86, %121 : vector<8x128xf32>
    %c1_i32_66 = arith.constant 1 : i32
    %123 = arith.addi %1, %c1_i32_66 : i32
    %c0_67 = arith.constant 0 : index
    %c1_68 = arith.constant 1 : index
    %124 = arith.index_cast %123 : i32 to index
    %c0_69 = arith.constant 0 : index
    %125 = vector.load %arg2[%c0_67, %c1_68, %124, %c0_69] : memref<1x4x18x18xf32, #tpu.memory_space<vmem>>, vector<1x1x8x16xf32>
    %126 = vector.shape_cast %125 : vector<1x1x8x16xf32> to vector<8x16xf32>
    %127 = tpu.concatenate %126, %126, %126, %126, %126, %126, %126, %126 in 1 : vector<8x16xf32>, vector<8x16xf32>, vector<8x16xf32>, vector<8x16xf32>, vector<8x16xf32>, vector<8x16xf32>, vector<8x16xf32>, vector<8x16xf32> -> vector<8x128xf32>
    %c13 = arith.constant 13 : index
    %c0_70 = arith.constant 0 : index
    %128 = vector.load %arg3[%c13, %c0_70] : memref<36x128xf32, #tpu.memory_space<vmem>>, vector<1x128xf32>
    %129 = vector.broadcast %128 : vector<1x128xf32> to vector<8x128xf32>
    %130 = arith.mulf %127, %129 : vector<8x128xf32>
    %131 = arith.addf %95, %130 : vector<8x128xf32>
    %c1_i32_71 = arith.constant 1 : i32
    %132 = arith.addi %1, %c1_i32_71 : i32
    %c0_72 = arith.constant 0 : index
    %c2_73 = arith.constant 2 : index
    %133 = arith.index_cast %132 : i32 to index
    %c0_74 = arith.constant 0 : index
    %134 = vector.load %arg2[%c0_72, %c2_73, %133, %c0_74] : memref<1x4x18x18xf32, #tpu.memory_space<vmem>>, vector<1x1x8x16xf32>
    %135 = vector.shape_cast %134 : vector<1x1x8x16xf32> to vector<8x16xf32>
    %136 = tpu.concatenate %135, %135, %135, %135, %135, %135, %135, %135 in 1 : vector<8x16xf32>, vector<8x16xf32>, vector<8x16xf32>, vector<8x16xf32>, vector<8x16xf32>, vector<8x16xf32>, vector<8x16xf32>, vector<8x16xf32> -> vector<8x128xf32>
    %c14 = arith.constant 14 : index
    %c0_75 = arith.constant 0 : index
    %137 = vector.load %arg3[%c14, %c0_75] : memref<36x128xf32, #tpu.memory_space<vmem>>, vector<1x128xf32>
    %138 = vector.broadcast %137 : vector<1x128xf32> to vector<8x128xf32>
    %139 = arith.mulf %136, %138 : vector<8x128xf32>
    %140 = arith.addf %104, %139 : vector<8x128xf32>
    %c1_i32_76 = arith.constant 1 : i32
    %141 = arith.addi %1, %c1_i32_76 : i32
    %c0_77 = arith.constant 0 : index
    %c3_78 = arith.constant 3 : index
    %142 = arith.index_cast %141 : i32 to index
    %c0_79 = arith.constant 0 : index
    %143 = vector.load %arg2[%c0_77, %c3_78, %142, %c0_79] : memref<1x4x18x18xf32, #tpu.memory_space<vmem>>, vector<1x1x8x16xf32>
    %144 = vector.shape_cast %143 : vector<1x1x8x16xf32> to vector<8x16xf32>
    %145 = tpu.concatenate %144, %144, %144, %144, %144, %144, %144, %144 in 1 : vector<8x16xf32>, vector<8x16xf32>, vector<8x16xf32>, vector<8x16xf32>, vector<8x16xf32>, vector<8x16xf32>, vector<8x16xf32>, vector<8x16xf32> -> vector<8x128xf32>
    %c15 = arith.constant 15 : index
    %c0_80 = arith.constant 0 : index
    %146 = vector.load %arg3[%c15, %c0_80] : memref<36x128xf32, #tpu.memory_space<vmem>>, vector<1x128xf32>
    %147 = vector.broadcast %146 : vector<1x128xf32> to vector<8x128xf32>
    %148 = arith.mulf %145, %147 : vector<8x128xf32>
    %149 = arith.addf %113, %148 : vector<8x128xf32>
    %c1_i32_81 = arith.constant 1 : i32
    %150 = arith.addi %1, %c1_i32_81 : i32
    %c0_82 = arith.constant 0 : index
    %c0_83 = arith.constant 0 : index
    %151 = arith.index_cast %150 : i32 to index
    %c1_84 = arith.constant 1 : index
    %152 = vector.load %arg2[%c0_82, %c0_83, %151, %c1_84] : memref<1x4x18x18xf32, #tpu.memory_space<vmem>>, vector<1x1x8x16xf32>
    %153 = vector.shape_cast %152 : vector<1x1x8x16xf32> to vector<8x16xf32>
    %154 = tpu.concatenate %153, %153, %153, %153, %153, %153, %153, %153 in 1 : vector<8x16xf32>, vector<8x16xf32>, vector<8x16xf32>, vector<8x16xf32>, vector<8x16xf32>, vector<8x16xf32>, vector<8x16xf32>, vector<8x16xf32> -> vector<8x128xf32>
    %c16 = arith.constant 16 : index
    %c0_85 = arith.constant 0 : index
    %155 = vector.load %arg3[%c16, %c0_85] : memref<36x128xf32, #tpu.memory_space<vmem>>, vector<1x128xf32>
    %156 = vector.broadcast %155 : vector<1x128xf32> to vector<8x128xf32>
    %157 = arith.mulf %154, %156 : vector<8x128xf32>
    %158 = arith.addf %122, %157 : vector<8x128xf32>
    %c1_i32_86 = arith.constant 1 : i32
    %159 = arith.addi %1, %c1_i32_86 : i32
    %c0_87 = arith.constant 0 : index
    %c1_88 = arith.constant 1 : index
    %160 = arith.index_cast %159 : i32 to index
    %c1_89 = arith.constant 1 : index
    %161 = vector.load %arg2[%c0_87, %c1_88, %160, %c1_89] : memref<1x4x18x18xf32, #tpu.memory_space<vmem>>, vector<1x1x8x16xf32>
    %162 = vector.shape_cast %161 : vector<1x1x8x16xf32> to vector<8x16xf32>
    %163 = tpu.concatenate %162, %162, %162, %162, %162, %162, %162, %162 in 1 : vector<8x16xf32>, vector<8x16xf32>, vector<8x16xf32>, vector<8x16xf32>, vector<8x16xf32>, vector<8x16xf32>, vector<8x16xf32>, vector<8x16xf32> -> vector<8x128xf32>
    %c17 = arith.constant 17 : index
    %c0_90 = arith.constant 0 : index
    %164 = vector.load %arg3[%c17, %c0_90] : memref<36x128xf32, #tpu.memory_space<vmem>>, vector<1x128xf32>
    %165 = vector.broadcast %164 : vector<1x128xf32> to vector<8x128xf32>
    %166 = arith.mulf %163, %165 : vector<8x128xf32>
    %167 = arith.addf %131, %166 : vector<8x128xf32>
    %c1_i32_91 = arith.constant 1 : i32
    %168 = arith.addi %1, %c1_i32_91 : i32
    %c0_92 = arith.constant 0 : index
    %c2_93 = arith.constant 2 : index
    %169 = arith.index_cast %168 : i32 to index
    %c1_94 = arith.constant 1 : index
    %170 = vector.load %arg2[%c0_92, %c2_93, %169, %c1_94] : memref<1x4x18x18xf32, #tpu.memory_space<vmem>>, vector<1x1x8x16xf32>
    %171 = vector.shape_cast %170 : vector<1x1x8x16xf32> to vector<8x16xf32>
    %172 = tpu.concatenate %171, %171, %171, %171, %171, %171, %171, %171 in 1 : vector<8x16xf32>, vector<8x16xf32>, vector<8x16xf32>, vector<8x16xf32>, vector<8x16xf32>, vector<8x16xf32>, vector<8x16xf32>, vector<8x16xf32> -> vector<8x128xf32>
    %c18 = arith.constant 18 : index
    %c0_95 = arith.constant 0 : index
    %173 = vector.load %arg3[%c18, %c0_95] : memref<36x128xf32, #tpu.memory_space<vmem>>, vector<1x128xf32>
    %174 = vector.broadcast %173 : vector<1x128xf32> to vector<8x128xf32>
    %175 = arith.mulf %172, %174 : vector<8x128xf32>
    %176 = arith.addf %140, %175 : vector<8x128xf32>
    %c1_i32_96 = arith.constant 1 : i32
    %177 = arith.addi %1, %c1_i32_96 : i32
    %c0_97 = arith.constant 0 : index
    %c3_98 = arith.constant 3 : index
    %178 = arith.index_cast %177 : i32 to index
    %c1_99 = arith.constant 1 : index
    %179 = vector.load %arg2[%c0_97, %c3_98, %178, %c1_99] : memref<1x4x18x18xf32, #tpu.memory_space<vmem>>, vector<1x1x8x16xf32>
    %180 = vector.shape_cast %179 : vector<1x1x8x16xf32> to vector<8x16xf32>
    %181 = tpu.concatenate %180, %180, %180, %180, %180, %180, %180, %180 in 1 : vector<8x16xf32>, vector<8x16xf32>, vector<8x16xf32>, vector<8x16xf32>, vector<8x16xf32>, vector<8x16xf32>, vector<8x16xf32>, vector<8x16xf32> -> vector<8x128xf32>
    %c19 = arith.constant 19 : index
    %c0_100 = arith.constant 0 : index
    %182 = vector.load %arg3[%c19, %c0_100] : memref<36x128xf32, #tpu.memory_space<vmem>>, vector<1x128xf32>
    %183 = vector.broadcast %182 : vector<1x128xf32> to vector<8x128xf32>
    %184 = arith.mulf %181, %183 : vector<8x128xf32>
    %185 = arith.addf %149, %184 : vector<8x128xf32>
    %c1_i32_101 = arith.constant 1 : i32
    %186 = arith.addi %1, %c1_i32_101 : i32
    %c0_102 = arith.constant 0 : index
    %c0_103 = arith.constant 0 : index
    %187 = arith.index_cast %186 : i32 to index
    %c2_104 = arith.constant 2 : index
    %188 = vector.load %arg2[%c0_102, %c0_103, %187, %c2_104] : memref<1x4x18x18xf32, #tpu.memory_space<vmem>>, vector<1x1x8x16xf32>
    %189 = vector.shape_cast %188 : vector<1x1x8x16xf32> to vector<8x16xf32>
    %190 = tpu.concatenate %189, %189, %189, %189, %189, %189, %189, %189 in 1 : vector<8x16xf32>, vector<8x16xf32>, vector<8x16xf32>, vector<8x16xf32>, vector<8x16xf32>, vector<8x16xf32>, vector<8x16xf32>, vector<8x16xf32> -> vector<8x128xf32>
    %c20 = arith.constant 20 : index
    %c0_105 = arith.constant 0 : index
    %191 = vector.load %arg3[%c20, %c0_105] : memref<36x128xf32, #tpu.memory_space<vmem>>, vector<1x128xf32>
    %192 = vector.broadcast %191 : vector<1x128xf32> to vector<8x128xf32>
    %193 = arith.mulf %190, %192 : vector<8x128xf32>
    %194 = arith.addf %158, %193 : vector<8x128xf32>
    %c1_i32_106 = arith.constant 1 : i32
    %195 = arith.addi %1, %c1_i32_106 : i32
    %c0_107 = arith.constant 0 : index
    %c1_108 = arith.constant 1 : index
    %196 = arith.index_cast %195 : i32 to index
    %c2_109 = arith.constant 2 : index
    %197 = vector.load %arg2[%c0_107, %c1_108, %196, %c2_109] : memref<1x4x18x18xf32, #tpu.memory_space<vmem>>, vector<1x1x8x16xf32>
    %198 = vector.shape_cast %197 : vector<1x1x8x16xf32> to vector<8x16xf32>
    %199 = tpu.concatenate %198, %198, %198, %198, %198, %198, %198, %198 in 1 : vector<8x16xf32>, vector<8x16xf32>, vector<8x16xf32>, vector<8x16xf32>, vector<8x16xf32>, vector<8x16xf32>, vector<8x16xf32>, vector<8x16xf32> -> vector<8x128xf32>
    %c21 = arith.constant 21 : index
    %c0_110 = arith.constant 0 : index
    %200 = vector.load %arg3[%c21, %c0_110] : memref<36x128xf32, #tpu.memory_space<vmem>>, vector<1x128xf32>
    %201 = vector.broadcast %200 : vector<1x128xf32> to vector<8x128xf32>
    %202 = arith.mulf %199, %201 : vector<8x128xf32>
    %203 = arith.addf %167, %202 : vector<8x128xf32>
    %c1_i32_111 = arith.constant 1 : i32
    %204 = arith.addi %1, %c1_i32_111 : i32
    %c0_112 = arith.constant 0 : index
    %c2_113 = arith.constant 2 : index
    %205 = arith.index_cast %204 : i32 to index
    %c2_114 = arith.constant 2 : index
    %206 = vector.load %arg2[%c0_112, %c2_113, %205, %c2_114] : memref<1x4x18x18xf32, #tpu.memory_space<vmem>>, vector<1x1x8x16xf32>
    %207 = vector.shape_cast %206 : vector<1x1x8x16xf32> to vector<8x16xf32>
    %208 = tpu.concatenate %207, %207, %207, %207, %207, %207, %207, %207 in 1 : vector<8x16xf32>, vector<8x16xf32>, vector<8x16xf32>, vector<8x16xf32>, vector<8x16xf32>, vector<8x16xf32>, vector<8x16xf32>, vector<8x16xf32> -> vector<8x128xf32>
    %c22 = arith.constant 22 : index
    %c0_115 = arith.constant 0 : index
    %209 = vector.load %arg3[%c22, %c0_115] : memref<36x128xf32, #tpu.memory_space<vmem>>, vector<1x128xf32>
    %210 = vector.broadcast %209 : vector<1x128xf32> to vector<8x128xf32>
    %211 = arith.mulf %208, %210 : vector<8x128xf32>
    %212 = arith.addf %176, %211 : vector<8x128xf32>
    %c1_i32_116 = arith.constant 1 : i32
    %213 = arith.addi %1, %c1_i32_116 : i32
    %c0_117 = arith.constant 0 : index
    %c3_118 = arith.constant 3 : index
    %214 = arith.index_cast %213 : i32 to index
    %c2_119 = arith.constant 2 : index
    %215 = vector.load %arg2[%c0_117, %c3_118, %214, %c2_119] : memref<1x4x18x18xf32, #tpu.memory_space<vmem>>, vector<1x1x8x16xf32>
    %216 = vector.shape_cast %215 : vector<1x1x8x16xf32> to vector<8x16xf32>
    %217 = tpu.concatenate %216, %216, %216, %216, %216, %216, %216, %216 in 1 : vector<8x16xf32>, vector<8x16xf32>, vector<8x16xf32>, vector<8x16xf32>, vector<8x16xf32>, vector<8x16xf32>, vector<8x16xf32>, vector<8x16xf32> -> vector<8x128xf32>
    %c23 = arith.constant 23 : index
    %c0_120 = arith.constant 0 : index
    %218 = vector.load %arg3[%c23, %c0_120] : memref<36x128xf32, #tpu.memory_space<vmem>>, vector<1x128xf32>
    %219 = vector.broadcast %218 : vector<1x128xf32> to vector<8x128xf32>
    %220 = arith.mulf %217, %219 : vector<8x128xf32>
    %221 = arith.addf %185, %220 : vector<8x128xf32>
    %c2_i32 = arith.constant 2 : i32
    %222 = arith.addi %1, %c2_i32 : i32
    %c0_121 = arith.constant 0 : index
    %c0_122 = arith.constant 0 : index
    %223 = arith.index_cast %222 : i32 to index
    %c0_123 = arith.constant 0 : index
    %224 = vector.load %arg2[%c0_121, %c0_122, %223, %c0_123] : memref<1x4x18x18xf32, #tpu.memory_space<vmem>>, vector<1x1x8x16xf32>
    %225 = vector.shape_cast %224 : vector<1x1x8x16xf32> to vector<8x16xf32>
    %226 = tpu.concatenate %225, %225, %225, %225, %225, %225, %225, %225 in 1 : vector<8x16xf32>, vector<8x16xf32>, vector<8x16xf32>, vector<8x16xf32>, vector<8x16xf32>, vector<8x16xf32>, vector<8x16xf32>, vector<8x16xf32> -> vector<8x128xf32>
    %c24 = arith.constant 24 : index
    %c0_124 = arith.constant 0 : index
    %227 = vector.load %arg3[%c24, %c0_124] : memref<36x128xf32, #tpu.memory_space<vmem>>, vector<1x128xf32>
    %228 = vector.broadcast %227 : vector<1x128xf32> to vector<8x128xf32>
    %229 = arith.mulf %226, %228 : vector<8x128xf32>
    %230 = arith.addf %194, %229 : vector<8x128xf32>
    %c2_i32_125 = arith.constant 2 : i32
    %231 = arith.addi %1, %c2_i32_125 : i32
    %c0_126 = arith.constant 0 : index
    %c1_127 = arith.constant 1 : index
    %232 = arith.index_cast %231 : i32 to index
    %c0_128 = arith.constant 0 : index
    %233 = vector.load %arg2[%c0_126, %c1_127, %232, %c0_128] : memref<1x4x18x18xf32, #tpu.memory_space<vmem>>, vector<1x1x8x16xf32>
    %234 = vector.shape_cast %233 : vector<1x1x8x16xf32> to vector<8x16xf32>
    %235 = tpu.concatenate %234, %234, %234, %234, %234, %234, %234, %234 in 1 : vector<8x16xf32>, vector<8x16xf32>, vector<8x16xf32>, vector<8x16xf32>, vector<8x16xf32>, vector<8x16xf32>, vector<8x16xf32>, vector<8x16xf32> -> vector<8x128xf32>
    %c25 = arith.constant 25 : index
    %c0_129 = arith.constant 0 : index
    %236 = vector.load %arg3[%c25, %c0_129] : memref<36x128xf32, #tpu.memory_space<vmem>>, vector<1x128xf32>
    %237 = vector.broadcast %236 : vector<1x128xf32> to vector<8x128xf32>
    %238 = arith.mulf %235, %237 : vector<8x128xf32>
    %239 = arith.addf %203, %238 : vector<8x128xf32>
    %c2_i32_130 = arith.constant 2 : i32
    %240 = arith.addi %1, %c2_i32_130 : i32
    %c0_131 = arith.constant 0 : index
    %c2_132 = arith.constant 2 : index
    %241 = arith.index_cast %240 : i32 to index
    %c0_133 = arith.constant 0 : index
    %242 = vector.load %arg2[%c0_131, %c2_132, %241, %c0_133] : memref<1x4x18x18xf32, #tpu.memory_space<vmem>>, vector<1x1x8x16xf32>
    %243 = vector.shape_cast %242 : vector<1x1x8x16xf32> to vector<8x16xf32>
    %244 = tpu.concatenate %243, %243, %243, %243, %243, %243, %243, %243 in 1 : vector<8x16xf32>, vector<8x16xf32>, vector<8x16xf32>, vector<8x16xf32>, vector<8x16xf32>, vector<8x16xf32>, vector<8x16xf32>, vector<8x16xf32> -> vector<8x128xf32>
    %c26 = arith.constant 26 : index
    %c0_134 = arith.constant 0 : index
    %245 = vector.load %arg3[%c26, %c0_134] : memref<36x128xf32, #tpu.memory_space<vmem>>, vector<1x128xf32>
    %246 = vector.broadcast %245 : vector<1x128xf32> to vector<8x128xf32>
    %247 = arith.mulf %244, %246 : vector<8x128xf32>
    %248 = arith.addf %212, %247 : vector<8x128xf32>
    %c2_i32_135 = arith.constant 2 : i32
    %249 = arith.addi %1, %c2_i32_135 : i32
    %c0_136 = arith.constant 0 : index
    %c3_137 = arith.constant 3 : index
    %250 = arith.index_cast %249 : i32 to index
    %c0_138 = arith.constant 0 : index
    %251 = vector.load %arg2[%c0_136, %c3_137, %250, %c0_138] : memref<1x4x18x18xf32, #tpu.memory_space<vmem>>, vector<1x1x8x16xf32>
    %252 = vector.shape_cast %251 : vector<1x1x8x16xf32> to vector<8x16xf32>
    %253 = tpu.concatenate %252, %252, %252, %252, %252, %252, %252, %252 in 1 : vector<8x16xf32>, vector<8x16xf32>, vector<8x16xf32>, vector<8x16xf32>, vector<8x16xf32>, vector<8x16xf32>, vector<8x16xf32>, vector<8x16xf32> -> vector<8x128xf32>
    %c27 = arith.constant 27 : index
    %c0_139 = arith.constant 0 : index
    %254 = vector.load %arg3[%c27, %c0_139] : memref<36x128xf32, #tpu.memory_space<vmem>>, vector<1x128xf32>
    %255 = vector.broadcast %254 : vector<1x128xf32> to vector<8x128xf32>
    %256 = arith.mulf %253, %255 : vector<8x128xf32>
    %257 = arith.addf %221, %256 : vector<8x128xf32>
    %c2_i32_140 = arith.constant 2 : i32
    %258 = arith.addi %1, %c2_i32_140 : i32
    %c0_141 = arith.constant 0 : index
    %c0_142 = arith.constant 0 : index
    %259 = arith.index_cast %258 : i32 to index
    %c1_143 = arith.constant 1 : index
    %260 = vector.load %arg2[%c0_141, %c0_142, %259, %c1_143] : memref<1x4x18x18xf32, #tpu.memory_space<vmem>>, vector<1x1x8x16xf32>
    %261 = vector.shape_cast %260 : vector<1x1x8x16xf32> to vector<8x16xf32>
    %262 = tpu.concatenate %261, %261, %261, %261, %261, %261, %261, %261 in 1 : vector<8x16xf32>, vector<8x16xf32>, vector<8x16xf32>, vector<8x16xf32>, vector<8x16xf32>, vector<8x16xf32>, vector<8x16xf32>, vector<8x16xf32> -> vector<8x128xf32>
    %c28 = arith.constant 28 : index
    %c0_144 = arith.constant 0 : index
    %263 = vector.load %arg3[%c28, %c0_144] : memref<36x128xf32, #tpu.memory_space<vmem>>, vector<1x128xf32>
    %264 = vector.broadcast %263 : vector<1x128xf32> to vector<8x128xf32>
    %265 = arith.mulf %262, %264 : vector<8x128xf32>
    %266 = arith.addf %230, %265 : vector<8x128xf32>
    %c2_i32_145 = arith.constant 2 : i32
    %267 = arith.addi %1, %c2_i32_145 : i32
    %c0_146 = arith.constant 0 : index
    %c1_147 = arith.constant 1 : index
    %268 = arith.index_cast %267 : i32 to index
    %c1_148 = arith.constant 1 : index
    %269 = vector.load %arg2[%c0_146, %c1_147, %268, %c1_148] : memref<1x4x18x18xf32, #tpu.memory_space<vmem>>, vector<1x1x8x16xf32>
    %270 = vector.shape_cast %269 : vector<1x1x8x16xf32> to vector<8x16xf32>
    %271 = tpu.concatenate %270, %270, %270, %270, %270, %270, %270, %270 in 1 : vector<8x16xf32>, vector<8x16xf32>, vector<8x16xf32>, vector<8x16xf32>, vector<8x16xf32>, vector<8x16xf32>, vector<8x16xf32>, vector<8x16xf32> -> vector<8x128xf32>
    %c29 = arith.constant 29 : index
    %c0_149 = arith.constant 0 : index
    %272 = vector.load %arg3[%c29, %c0_149] : memref<36x128xf32, #tpu.memory_space<vmem>>, vector<1x128xf32>
    %273 = vector.broadcast %272 : vector<1x128xf32> to vector<8x128xf32>
    %274 = arith.mulf %271, %273 : vector<8x128xf32>
    %275 = arith.addf %239, %274 : vector<8x128xf32>
    %c2_i32_150 = arith.constant 2 : i32
    %276 = arith.addi %1, %c2_i32_150 : i32
    %c0_151 = arith.constant 0 : index
    %c2_152 = arith.constant 2 : index
    %277 = arith.index_cast %276 : i32 to index
    %c1_153 = arith.constant 1 : index
    %278 = vector.load %arg2[%c0_151, %c2_152, %277, %c1_153] : memref<1x4x18x18xf32, #tpu.memory_space<vmem>>, vector<1x1x8x16xf32>
    %279 = vector.shape_cast %278 : vector<1x1x8x16xf32> to vector<8x16xf32>
    %280 = tpu.concatenate %279, %279, %279, %279, %279, %279, %279, %279 in 1 : vector<8x16xf32>, vector<8x16xf32>, vector<8x16xf32>, vector<8x16xf32>, vector<8x16xf32>, vector<8x16xf32>, vector<8x16xf32>, vector<8x16xf32> -> vector<8x128xf32>
    %c30 = arith.constant 30 : index
    %c0_154 = arith.constant 0 : index
    %281 = vector.load %arg3[%c30, %c0_154] : memref<36x128xf32, #tpu.memory_space<vmem>>, vector<1x128xf32>
    %282 = vector.broadcast %281 : vector<1x128xf32> to vector<8x128xf32>
    %283 = arith.mulf %280, %282 : vector<8x128xf32>
    %284 = arith.addf %248, %283 : vector<8x128xf32>
    %c2_i32_155 = arith.constant 2 : i32
    %285 = arith.addi %1, %c2_i32_155 : i32
    %c0_156 = arith.constant 0 : index
    %c3_157 = arith.constant 3 : index
    %286 = arith.index_cast %285 : i32 to index
    %c1_158 = arith.constant 1 : index
    %287 = vector.load %arg2[%c0_156, %c3_157, %286, %c1_158] : memref<1x4x18x18xf32, #tpu.memory_space<vmem>>, vector<1x1x8x16xf32>
    %288 = vector.shape_cast %287 : vector<1x1x8x16xf32> to vector<8x16xf32>
    %289 = tpu.concatenate %288, %288, %288, %288, %288, %288, %288, %288 in 1 : vector<8x16xf32>, vector<8x16xf32>, vector<8x16xf32>, vector<8x16xf32>, vector<8x16xf32>, vector<8x16xf32>, vector<8x16xf32>, vector<8x16xf32> -> vector<8x128xf32>
    %c31 = arith.constant 31 : index
    %c0_159 = arith.constant 0 : index
    %290 = vector.load %arg3[%c31, %c0_159] : memref<36x128xf32, #tpu.memory_space<vmem>>, vector<1x128xf32>
    %291 = vector.broadcast %290 : vector<1x128xf32> to vector<8x128xf32>
    %292 = arith.mulf %289, %291 : vector<8x128xf32>
    %293 = arith.addf %257, %292 : vector<8x128xf32>
    %c2_i32_160 = arith.constant 2 : i32
    %294 = arith.addi %1, %c2_i32_160 : i32
    %c0_161 = arith.constant 0 : index
    %c0_162 = arith.constant 0 : index
    %295 = arith.index_cast %294 : i32 to index
    %c2_163 = arith.constant 2 : index
    %296 = vector.load %arg2[%c0_161, %c0_162, %295, %c2_163] : memref<1x4x18x18xf32, #tpu.memory_space<vmem>>, vector<1x1x8x16xf32>
    %297 = vector.shape_cast %296 : vector<1x1x8x16xf32> to vector<8x16xf32>
    %298 = tpu.concatenate %297, %297, %297, %297, %297, %297, %297, %297 in 1 : vector<8x16xf32>, vector<8x16xf32>, vector<8x16xf32>, vector<8x16xf32>, vector<8x16xf32>, vector<8x16xf32>, vector<8x16xf32>, vector<8x16xf32> -> vector<8x128xf32>
    %c32 = arith.constant 32 : index
    %c0_164 = arith.constant 0 : index
    %299 = vector.load %arg3[%c32, %c0_164] : memref<36x128xf32, #tpu.memory_space<vmem>>, vector<1x128xf32>
    %300 = vector.broadcast %299 : vector<1x128xf32> to vector<8x128xf32>
    %301 = arith.mulf %298, %300 : vector<8x128xf32>
    %302 = arith.addf %266, %301 : vector<8x128xf32>
    %c2_i32_165 = arith.constant 2 : i32
    %303 = arith.addi %1, %c2_i32_165 : i32
    %c0_166 = arith.constant 0 : index
    %c1_167 = arith.constant 1 : index
    %304 = arith.index_cast %303 : i32 to index
    %c2_168 = arith.constant 2 : index
    %305 = vector.load %arg2[%c0_166, %c1_167, %304, %c2_168] : memref<1x4x18x18xf32, #tpu.memory_space<vmem>>, vector<1x1x8x16xf32>
    %306 = vector.shape_cast %305 : vector<1x1x8x16xf32> to vector<8x16xf32>
    %307 = tpu.concatenate %306, %306, %306, %306, %306, %306, %306, %306 in 1 : vector<8x16xf32>, vector<8x16xf32>, vector<8x16xf32>, vector<8x16xf32>, vector<8x16xf32>, vector<8x16xf32>, vector<8x16xf32>, vector<8x16xf32> -> vector<8x128xf32>
    %c33 = arith.constant 33 : index
    %c0_169 = arith.constant 0 : index
    %308 = vector.load %arg3[%c33, %c0_169] : memref<36x128xf32, #tpu.memory_space<vmem>>, vector<1x128xf32>
    %309 = vector.broadcast %308 : vector<1x128xf32> to vector<8x128xf32>
    %310 = arith.mulf %307, %309 : vector<8x128xf32>
    %311 = arith.addf %275, %310 : vector<8x128xf32>
    %c2_i32_170 = arith.constant 2 : i32
    %312 = arith.addi %1, %c2_i32_170 : i32
    %c0_171 = arith.constant 0 : index
    %c2_172 = arith.constant 2 : index
    %313 = arith.index_cast %312 : i32 to index
    %c2_173 = arith.constant 2 : index
    %314 = vector.load %arg2[%c0_171, %c2_172, %313, %c2_173] : memref<1x4x18x18xf32, #tpu.memory_space<vmem>>, vector<1x1x8x16xf32>
    %315 = vector.shape_cast %314 : vector<1x1x8x16xf32> to vector<8x16xf32>
    %316 = tpu.concatenate %315, %315, %315, %315, %315, %315, %315, %315 in 1 : vector<8x16xf32>, vector<8x16xf32>, vector<8x16xf32>, vector<8x16xf32>, vector<8x16xf32>, vector<8x16xf32>, vector<8x16xf32>, vector<8x16xf32> -> vector<8x128xf32>
    %c34 = arith.constant 34 : index
    %c0_174 = arith.constant 0 : index
    %317 = vector.load %arg3[%c34, %c0_174] : memref<36x128xf32, #tpu.memory_space<vmem>>, vector<1x128xf32>
    %318 = vector.broadcast %317 : vector<1x128xf32> to vector<8x128xf32>
    %319 = arith.mulf %316, %318 : vector<8x128xf32>
    %320 = arith.addf %284, %319 : vector<8x128xf32>
    %c2_i32_175 = arith.constant 2 : i32
    %321 = arith.addi %1, %c2_i32_175 : i32
    %c0_176 = arith.constant 0 : index
    %c3_177 = arith.constant 3 : index
    %322 = arith.index_cast %321 : i32 to index
    %c2_178 = arith.constant 2 : index
    %323 = vector.load %arg2[%c0_176, %c3_177, %322, %c2_178] : memref<1x4x18x18xf32, #tpu.memory_space<vmem>>, vector<1x1x8x16xf32>
    %324 = vector.shape_cast %323 : vector<1x1x8x16xf32> to vector<8x16xf32>
    %325 = tpu.concatenate %324, %324, %324, %324, %324, %324, %324, %324 in 1 : vector<8x16xf32>, vector<8x16xf32>, vector<8x16xf32>, vector<8x16xf32>, vector<8x16xf32>, vector<8x16xf32>, vector<8x16xf32>, vector<8x16xf32> -> vector<8x128xf32>
    %c35 = arith.constant 35 : index
    %c0_179 = arith.constant 0 : index
    %326 = vector.load %arg3[%c35, %c0_179] : memref<36x128xf32, #tpu.memory_space<vmem>>, vector<1x128xf32>
    %327 = vector.broadcast %326 : vector<1x128xf32> to vector<8x128xf32>
    %328 = arith.mulf %325, %327 : vector<8x128xf32>
    %329 = arith.addf %293, %328 : vector<8x128xf32>
    %330 = arith.addf %302, %311 : vector<8x128xf32>
    %331 = arith.addf %330, %320 : vector<8x128xf32>
    %332 = arith.addf %331, %329 : vector<8x128xf32>
    %cst_180 = arith.constant 0.000000e+00 : f32
    %333 = vector.broadcast %cst_180 : f32 to vector<8x128xf32>
    %334 = arith.maximumf %332, %333 : vector<8x128xf32>
    %c0_181 = arith.constant 0 : index
    %c0_182 = arith.constant 0 : index
    %c0_183 = arith.constant 0 : index
    %335 = vector.load %arg4[%c0_181, %c0_182, %c0_183] : memref<1x8x128xf32, #tpu.memory_space<vmem>>, vector<1x8x128xf32>
    %336 = vector.shape_cast %335 : vector<1x8x128xf32> to vector<8x128xf32>
    %337 = vector.shape_cast %334 : vector<8x128xf32> to vector<1x8x128xf32>
    tpu.vector_store %arg4[%c0_181, %c0_182, %c0_183], %337 {strides = array<i32>} : memref<1x8x128xf32, #tpu.memory_space<vmem>>, vector<1x8x128xf32>,
    return
  }
  func.func @transform_0(%arg0: i32, %arg1: i32) -> (i32, i32, i32, i32) {
    %c0_i32 = arith.constant 0 : i32
    %c0_i32_0 = arith.constant 0 : i32
    %c0_i32_1 = arith.constant 0 : i32
    %c0_i32_2 = arith.constant 0 : i32
    return %arg0, %c0_i32, %c0_i32_0, %c0_i32_1 : i32, i32, i32, i32
  }
  func.func @transform_1(%arg0: i32, %arg1: i32) -> (i32, i32) {
    %c0_i32 = arith.constant 0 : i32
    %c0_i32_0 = arith.constant 0 : i32
    %c0_i32_1 = arith.constant 0 : i32
    return %c0_i32, %c0_i32_0 : i32, i32
  }
  func.func @transform_2(%arg0: i32, %arg1: i32) -> (i32, i32, i32) {
    %c0_i32 = arith.constant 0 : i32
    %c0_i32_0 = arith.constant 0 : i32
    return %arg0, %arg1, %c0_i32 : i32, i32, i32
  }
}

</mosaic_0001>

<bundles_post_ra>
// kernel: tpu_custom_call.1
= control target key start
LH: loop header
LB: loop body
LE: loop exit
PB: predicated region body
PF: predicated region fallthrough
CT: control target
= control target key end

     0   :  { %s3629_s0 = inlined_call_operand.vmem [shape: f32[2,4,18,18], index: 0, kind: input, shape index: {}]   ;;  %s3630_s1 = inlined_call_operand.vmem [shape: f32[36,128], index: 1, kind: input, shape index: {}]   ;;  %s3631_s2 = inlined_call_operand.hbm [shape: f32[2,16,128], index: 2, kind: output, shape index: {}]  }
   0x1   :  { %3686 = sst [smem:[#allocation145_spill]] %s3629_s0 }
   0x2   :  { %7 = vsyncpa [#allocation3], 0 }
   0x3   :  { %9 = vsyncpa [#allocation3 + $0x1], 0  ;;  %s1976_s9 = smov 0   ;;  %s1978_s10 = smov 0  }
   0x4   :  { %s1980_s11 = smov 0   ;;  %s1982_s12 = smov 0  }
   0x5   :  { %s1984_s13 = smov 0   ;;  %s1986_s14 = smov 0  }
   0x6   :  { %s1988_s15 = smov 0   ;;  %s1990_s16 = smov 0  }
   0x7 LB: > { %3687 = sst [smem:[#allocation5_spill]] %s1907_s9  ;;  %s1671_s17 = sadd.s32 4294967295, %s1935_s16   ;;  %s1935_s16 = sphi %s1990_s16, %s15_s16   ;;  %s1931_s15 = sphi %s1988_s15, %s3992_s15   ;;  %s1927_s14 = sphi %s1986_s14, %s3991_s14   ;;  %s1923_s13 = sphi %s1984_s13, %s3990_s13   ;;  %s1919_s12 = sphi %s1982_s12, %s3989_s12   ;;  %s1915_s11 = sphi %s1980_s11, %s3988_s11   ;;  %s1911_s10 = sphi %s1978_s10, %s3994_s10   ;;  %s1907_s9 = sphi %s1976_s9, %s3993_s9  }
   0x8   : > { %3688 = sst [smem:[#allocation6_spill]] %s1915_s11  ;;  %s1672_s18 = sadd.s32 4294967294, %s1935_s16  }
   0x9   : > { %3689 = sst [smem:[#allocation7_spill]] %s1927_s14  ;;  %s24_s19 = sadd.s32 1, %s1927_s14 }
   0xa   : > { %3690 = sst [smem:[#allocation8_spill]] %s1931_s15  ;;  %p25_p0 = scmp.ge.s32.totalorder %s24_s19, 2 }
   0xb   : > { %s27_s20 = sadd.s32 1, %s1931_s15  ;;  %p93_p1 = scmp.ne.s32.totalorder %s1915_s11, %s1911_s10 }
   0xc   : > { %p94_p2 = scmp.eq.s32.totalorder %s1671_s17, 3  ;;  %s3996_s19 = smov (%p25_p0, %s24_s19), 0 }
   0xd   : > { %3691 = sst [smem:[#allocation9_spill]] %s3996_s19  ;;  %s3998_s20 = smov (!%p25_p0, %s27_s20), %s1931_s15 }
   0xe   : > { %s79_s21 = ssub.s32 %s1927_s14, %s3996_s19  ;;  %p2027_p3 = por %p94_p2, %p93_p1 }
   0xf   : > { %p29_p4 = scmp.ge.s32.totalorder %s3998_s20, 2  ;;  %p99_p5 = scmp.ne.s32.totalorder %s1911_s10, %s1907_s9 }
  0x10   : > { %p100_p6 = scmp.eq.s32.totalorder %s1672_s18, 3  ;;  %p1675_p7 = scmp.ge.s32.totalorder %s1935_s16, 1 }
  0x11   : > { %s4000_s20 = smov (%p29_p4, %s3998_s20), 0  ;;  %p129_p9 = scmp.lt.s32.totalorder %s1935_s16, 5 }
  0x12   : > { %3693 = sst [smem:[#allocation10_spill]] %s4000_s20  ;;  %p2036_p8 = por %p100_p6, %p99_p5 }
  0x13   : > { %s78_s24 = ssub.s32 %s1931_s15, %s4000_s20  ;;  %s83_s25 = sadd.s32 1, %s1915_s11 }
  0x14   : > { %s3694_s23 = scalar_select %p2036_p8, 1, 0 }
  0x15   : > { %s80_s26 = sor.u32 %s79_s21, %s78_s24  ;;  %p130_p10 = pnand %p1675_p7, %p129_p9 }
  0x16   : > { %3695 = sst [smem:[#allocation11_spill]] %s3694_s23  ;;  %p81_p11 = scmp.eq.s32.totalorder %s80_s26, 0 }
  0x17   : > { %133 = sbr.rel (%p130_p10) target bundleno = 727 (0x2d7), region = 28 }
  0x18   : > { %s2045_s27 = scalar_select %p81_p11, %s1915_s11, %s83_s25  }
  0x1a   : > { %3696 = sst [smem:[#allocation12_spill]] %s2045_s27 }
  0x1e   : > { %p151_p12 = scmp.lt.s32.totalorder %s1923_s13, 1  ;;  %s1678_s30 = sshll.u32 %s1919_s12, 3  ;;  %vm181_vm0 = vcmask 130048   ;;  %vm183_vm1 = vcmask 261120   ;;  %vm185_vm2 = vcmask 392192   ;;  %vm187_vm3 = vcmask 523264  }
  0x1f   : > { %s3697_s0 = sld [smem:[#allocation145_spill]]  ;;  %s3652_s7 = smov 48   ;;  %vm189_vm4 = vcmask 654336   ;;  %vm191_vm5 = vcmask 785408   ;;  %vm193_vm6 = vcmask 916480  }
  0x20   : > { %s152_s28 = scalar_select %p151_p12, %s1923_s13, 1 }
  0x21   : > { %s3658_s8 = smov 16   ;;  %s3656_s17 = smov 64  }
  0x22   : > { %s1742_s29 = smul.u32 96, %s152_s28  ;;  %s3662_s18 = smov 32  }
  0x23   : > { %s3660_s21 = smov 96   ;;  %s3654_s24 = smov 80  }
  0x24   : > { %s3632_s25 = smov 112   ;;  %s3648_s26 = smov 15  }
  0x25   : > { %s155_s5 = scalar_lea.vmem %s3697_s0, %s1742_s29  ;;  %s3646_s28 = smov 127  }
  0x26   : > { %s2053_s6 = scalar_lea.vmem %s155_s5, %s1678_s30  ;;  %s3644_s29 = smov 47  }
  0x27   : > { %v2056_v0 = vld [vmem:[%s2053_s6] sm:$0xff]  ;;  %v2071_v1 = vld [vmem:[%s2053_s6 + $0x18] sm:$0xff]  ;;  %v2090_v2 = vld [vmem:[%s2053_s6 + $0x30] sm:$0xff]  ;;  %s3634_s30 = smov 31   ;;  %s3636_s3 = smov 79  }
  0x28   : > { %166 = vrot.lane.b32.xlu1 %v2056_v0, %s3652_s7  ;;  %160 = vrot.lane.b32.xlu0 %v2056_v0, %s3658_s8  ;;  %v2105_v3 = vld [vmem:[%s2053_s6 + $0x48] sm:$0xff]  ;;  %s3642_s4 = smov 63   ;;  %s3638_s5 = smov 111   ;;  %v2347_v45 = vld [vmem:[%s2053_s6 + $0x19] sm:$0xff] }
  0x29   : > { %v2320_v38 = vld [vmem:[%s2053_s6 + $0x1] sm:$0xff]  ;;  %v2382_v54 = vld [vmem:[%s2053_s6 + $0x31] sm:$0xff]  ;;  %v2409_v61 = vld [vmem:[%s2053_s6 + $0x49] sm:$0xff]  ;;  %s3782_s0 = smov 46   ;;  %s3783_s20 = smov 30  }
  0x2a   : > { %3713 = vst [vmem:[#allocation28_spill] sm:$0xff] %v2320_v38  ;;  %s3786_s19 = smov 78   ;;  %s3802_s15 = smov 32  }
  0x2b   : > { %s3803_s14 = smov 16   ;;  %s3806_s27 = smov 64  }
  0x2c   : > { %169 = vrot.lane.b32.xlu1 %v2056_v0, %s3656_s17  ;;  %163 = vrot.lane.b32.xlu0 %v2056_v0, %s3662_s18  ;;  %s3807_s11 = smov 48   ;;  %s3810_s23 = smov 96  }
  0x2d   : > { %s3811_s9 = smov 80  }
  0x30   : > { %175 = vrot.lane.b32.xlu1 %v2056_v0, %s3660_s21  ;;  %172 = vrot.lane.b32.xlu0 %v2056_v0, %s3654_s24 }
  0x34   : > { %206 = vrot.lane.b32.xlu1 %v2071_v1, %s3658_s8  ;;  %178 = vrot.lane.b32.xlu0 %v2056_v0, %s3632_s25 }
  0x38   : > { %212 = vrot.lane.b32.xlu1 %v2071_v1, %s3652_s7  ;;  %209 = vrot.lane.b32.xlu0 %v2071_v1, %s3662_s18 }
  0x3c   : > { %218 = vrot.lane.b32.xlu1 %v2071_v1, %s3654_s24  ;;  %215 = vrot.lane.b32.xlu0 %v2071_v1, %s3656_s17 }
  0x40   : > { %224 = vrot.lane.b32.xlu1 %v2071_v1, %s3632_s25  ;;  %221 = vrot.lane.b32.xlu0 %v2071_v1, %s3660_s21 }
  0x44   : > { %248 = vrot.lane.b32.xlu1 %v2090_v2, %s3662_s18  ;;  %245 = vrot.lane.b32.xlu0 %v2090_v2, %s3658_s8 }
  0x48   : > { %254 = vrot.lane.b32.xlu1 %v2090_v2, %s3656_s17  ;;  %251 = vrot.lane.b32.xlu0 %v2090_v2, %s3652_s7 }
  0x4c   : > { %260 = vrot.lane.b32.xlu1 %v2090_v2, %s3660_s21  ;;  %257 = vrot.lane.b32.xlu0 %v2090_v2, %s3654_s24 }
  0x50   : > { %284 = vrot.lane.b32.xlu1 %v2105_v3, %s3658_s8  ;;  %263 = vrot.lane.b32.xlu0 %v2090_v2, %s3632_s25 }
  0x54   : > { %290 = vrot.lane.b32.xlu1 %v2105_v3, %s3652_s7  ;;  %287 = vrot.lane.b32.xlu0 %v2105_v3, %s3662_s18 }
  0x58   : > { %296 = vrot.lane.b32.xlu1 %v2105_v3, %s3654_s24  ;;  %293 = vrot.lane.b32.xlu0 %v2105_v3, %s3656_s17 }
  0x5c   : > { %302 = vrot.lane.b32.xlu1 %v2105_v3, %s3632_s25  ;;  %299 = vrot.lane.b32.xlu0 %v2105_v3, %s3660_s21  ;;  %s3640_s25 = smov 95  }
  0x60   : > { %322 = vrot.lane.b32.xlu1 %v2056_v0, %s3648_s26  ;;  %319 = vrot.lane.b32.xlu0 %v2056_v0, %s3646_s28 }
  0x64   : > { %328 = vrot.lane.b32.xlu1 %v2056_v0, %s3644_s29  ;;  %325 = vrot.lane.b32.xlu0 %v2056_v0, %s3634_s30 }
  0x68   : > { %334 = vrot.lane.b32.xlu1 %v2056_v0, %s3636_s3  ;;  %331 = vrot.lane.b32.xlu0 %v2056_v0, %s3642_s4 }
  0x6c   : > { %340 = vrot.lane.b32.xlu1 %v2056_v0, %s3638_s5  ;;  %337 = vrot.lane.b32.xlu0 %v2056_v0, %s3640_s25 }
  0x70   : > { %360 = vrot.lane.b32.xlu1 %v2071_v1, %s3648_s26  ;;  %357 = vrot.lane.b32.xlu0 %v2071_v1, %s3646_s28 }
  0x74   : > { %366 = vrot.lane.b32.xlu1 %v2071_v1, %s3644_s29  ;;  %363 = vrot.lane.b32.xlu0 %v2071_v1, %s3634_s30 }
  0x78   : > { %372 = vrot.lane.b32.xlu1 %v2071_v1, %s3636_s3  ;;  %369 = vrot.lane.b32.xlu0 %v2071_v1, %s3642_s4 }
  0x7c   : > { %378 = vrot.lane.b32.xlu1 %v2071_v1, %s3638_s5  ;;  %375 = vrot.lane.b32.xlu0 %v2071_v1, %s3640_s25 }
  0x80   : > { %398 = vrot.lane.b32.xlu1 %v2090_v2, %s3648_s26  ;;  %395 = vrot.lane.b32.xlu0 %v2090_v2, %s3646_s28 }
  0x84   : > { %404 = vrot.lane.b32.xlu1 %v2090_v2, %s3644_s29  ;;  %401 = vrot.lane.b32.xlu0 %v2090_v2, %s3634_s30 }
  0x88   : > { %410 = vrot.lane.b32.xlu1 %v2090_v2, %s3636_s3  ;;  %407 = vrot.lane.b32.xlu0 %v2090_v2, %s3642_s4 }
  0x8c   : > { %416 = vrot.lane.b32.xlu1 %v2090_v2, %s3638_s5  ;;  %413 = vrot.lane.b32.xlu0 %v2090_v2, %s3640_s25 }
  0x90   : > { %436 = vrot.lane.b32.xlu1 %v2105_v3, %s3648_s26  ;;  %433 = vrot.lane.b32.xlu0 %v2105_v3, %s3646_s28  ;;  %s3664_s28 = smov 110   ;;  %s3650_s26 = smov 94  }
  0x94   : > { %442 = vrot.lane.b32.xlu1 %v2105_v3, %s3644_s29  ;;  %439 = vrot.lane.b32.xlu0 %v2105_v3, %s3634_s30  ;;  %s3668_s30 = smov 14   ;;  %s3666_s29 = smov 62  }
  0x98   : > { %448 = vrot.lane.b32.xlu1 %v2105_v3, %s3636_s3  ;;  %445 = vrot.lane.b32.xlu0 %v2105_v3, %s3642_s4  ;;  %s3670_s3 = smov 126   ;;  %s3676_s4 = smov 78  }
  0x9a   : > { %v2183_v4 = vpop.permute.xlu1 %166  ;;  %v2185_v5 = vpop.permute.xlu0 %160 }
  0x9c   : > { %454 = vrot.lane.b32.xlu1 %v2105_v3, %s3638_s5  ;;  %451 = vrot.lane.b32.xlu0 %v2105_v3, %s3640_s25  ;;  %s3672_s5 = smov 46   ;;  %s3674_s25 = smov 30  }
  0x9e   : > { %v2191_v6 = vpop.permute.xlu1 %169  ;;  %v2193_v7 = vpop.permute.xlu0 %163 }
  0xa0   : > { %474 = vrot.lane.b32.xlu1 %v2056_v0, %s3668_s30  ;;  %471 = vrot.lane.b32.xlu0 %v2056_v0, %s3670_s3 }
  0xa2   : > { %v2199_v8 = vpop.permute.xlu1 %175  ;;  %v2201_v9 = vpop.permute.xlu0 %172 }
  0xa4   : > { %480 = vrot.lane.b32.xlu1 %v2056_v0, %s3672_s5  ;;  %477 = vrot.lane.b32.xlu0 %v2056_v0, %s3674_s25 }
  0xa6   : > { %v2207_v10 = vpop.permute.xlu1 %206  ;;  %v2209_v11 = vpop.permute.xlu0 %178 }
  0xa8   : > { %486 = vrot.lane.b32.xlu1 %v2056_v0, %s3676_s4  ;;  %483 = vrot.lane.b32.xlu0 %v2056_v0, %s3666_s29 }
  0xaa   : > { %v2215_v12 = vpop.permute.xlu1 %212  ;;  %v2217_v13 = vpop.permute.xlu0 %209 }
  0xab   : > { %3698 = vst [vmem:[#allocation13_spill] sm:$0xff] %v2215_v12 }
  0xac   : > { %492 = vrot.lane.b32.xlu1 %v2056_v0, %s3664_s28  ;;  %489 = vrot.lane.b32.xlu0 %v2056_v0, %s3650_s26 }
  0xae   : > { %v2223_v14 = vpop.permute.xlu1 %218  ;;  %v2225_v15 = vpop.permute.xlu0 %215 }
  0xaf   : > { %3699 = vst [vmem:[#allocation14_spill] sm:$0xff] %v2223_v14  ;;  %3700 = vst [vmem:[#allocation15_spill] sm:$0xff] %v2225_v15 }
  0xb0   : > { %512 = vrot.lane.b32.xlu1 %v2071_v1, %s3668_s30  ;;  %509 = vrot.lane.b32.xlu0 %v2071_v1, %s3670_s3 }
  0xb2   : > { %v2231_v16 = vpop.permute.xlu1 %224  ;;  %v2233_v17 = vpop.permute.xlu0 %221 }
  0xb3   : > { %3701 = vst [vmem:[#allocation16_spill] sm:$0xff] %v2231_v16  ;;  %3702 = vst [vmem:[#allocation17_spill] sm:$0xff] %v2233_v17 }
  0xb4   : > { %518 = vrot.lane.b32.xlu1 %v2071_v1, %s3672_s5  ;;  %515 = vrot.lane.b32.xlu0 %v2071_v1, %s3674_s25 }
  0xb6   : > { %v2239_v18 = vpop.permute.xlu1 %248  ;;  %v2241_v19 = vpop.permute.xlu0 %245 }
  0xb7   : > { %3703 = vst [vmem:[#allocation18_spill] sm:$0xff] %v2239_v18  ;;  %3704 = vst [vmem:[#allocation19_spill] sm:$0xff] %v2241_v19 }
  0xb8   : > { %524 = vrot.lane.b32.xlu1 %v2071_v1, %s3676_s4  ;;  %521 = vrot.lane.b32.xlu0 %v2071_v1, %s3666_s29 }
  0xba   : > { %v2247_v20 = vpop.permute.xlu1 %254  ;;  %v2249_v21 = vpop.permute.xlu0 %251 }
  0xbb   : > { %3705 = vst [vmem:[#allocation20_spill] sm:$0xff] %v2247_v20  ;;  %3706 = vst [vmem:[#allocation21_spill] sm:$0xff] %v2249_v21 }
  0xbc   : > { %530 = vrot.lane.b32.xlu1 %v2071_v1, %s3664_s28  ;;  %527 = vrot.lane.b32.xlu0 %v2071_v1, %s3650_s26 }
  0xbe   : > { %v2255_v22 = vpop.permute.xlu1 %260  ;;  %v2257_v23 = vpop.permute.xlu0 %257 }
  0xbf   : > { %3707 = vst [vmem:[#allocation22_spill] sm:$0xff] %v2255_v22  ;;  %3708 = vst [vmem:[#allocation23_spill] sm:$0xff] %v2257_v23 }
  0xc0   : > { %550 = vrot.lane.b32.xlu1 %v2090_v2, %s3668_s30  ;;  %547 = vrot.lane.b32.xlu0 %v2090_v2, %s3670_s3 }
  0xc2   : > { %v2263_v24 = vpop.permute.xlu1 %284  ;;  %v2265_v25 = vpop.permute.xlu0 %263 }
  0xc3   : > { %3709 = vst [vmem:[#allocation24_spill] sm:$0xff] %v2265_v25 }
  0xc4   : > { %556 = vrot.lane.b32.xlu1 %v2090_v2, %s3672_s5  ;;  %553 = vrot.lane.b32.xlu0 %v2090_v2, %s3674_s25 }
  0xc6   : > { %v2271_v26 = vpop.permute.xlu1 %290  ;;  %v2273_v27 = vpop.permute.xlu0 %287 }
  0xc8   : > { %562 = vrot.lane.b32.xlu1 %v2090_v2, %s3676_s4  ;;  %559 = vrot.lane.b32.xlu0 %v2090_v2, %s3666_s29 }
  0xca   : > { %v2279_v28 = vpop.permute.xlu1 %296  ;;  %v2281_v29 = vpop.permute.xlu0 %293 }
  0xcc   : > { %568 = vrot.lane.b32.xlu1 %v2090_v2, %s3664_s28  ;;  %565 = vrot.lane.b32.xlu0 %v2090_v2, %s3650_s26 }
  0xce   : > { %v2287_v30 = vpop.permute.xlu1 %302  ;;  %v2289_v31 = vpop.permute.xlu0 %299 }
  0xd0   : > { %588 = vrot.lane.b32.xlu1 %v2105_v3, %s3668_s30  ;;  %585 = vrot.lane.b32.xlu0 %v2105_v3, %s3670_s3 }
  0xd2   : > { %v2295_v32 = vpop.permute.xlu1 %322  ;;  %v2297_v33 = vpop.permute.xlu0 %319 }
  0xd4   : > { %594 = vrot.lane.b32.xlu1 %v2105_v3, %s3672_s5  ;;  %591 = vrot.lane.b32.xlu0 %v2105_v3, %s3674_s25 }
  0xd6   : > { %v2303_v34 = vpop.permute.xlu1 %328  ;;  %v2305_v35 = vpop.permute.xlu0 %325 }
  0xd7   : > { %3710 = vst [vmem:[#allocation25_spill] sm:$0xff] %v2303_v34 }
  0xd8   : > { %600 = vrot.lane.b32.xlu1 %v2105_v3, %s3676_s4  ;;  %597 = vrot.lane.b32.xlu0 %v2105_v3, %s3666_s29  ;;  %s3747_s29 = smov 95  }
  0xda   : > { %v2311_v36 = vpop.permute.xlu1 %334  ;;  %v2313_v37 = vpop.permute.xlu0 %331 }
  0xdb   : > { %3711 = vst [vmem:[#allocation26_spill] sm:$0xff] %v2311_v36  ;;  %3712 = vst [vmem:[#allocation27_spill] sm:$0xff] %v2313_v37 }
  0xdc   : > { %606 = vrot.lane.b32.xlu1 %v2105_v3, %s3664_s28  ;;  %603 = vrot.lane.b32.xlu0 %v2105_v3, %s3650_s26  ;;  %s3722_s26 = smov 112   ;;  %s3746_s28 = smov 111  }
  0xde   : > { %v2322_v39 = vpop.permute.xlu1 %340  ;;  %v2324_v40 = vpop.permute.xlu0 %337 }
  0xdf   : > { %3714 = vst [vmem:[#allocation29_spill] sm:$0xff] %v2322_v39  ;;  %3715 = vst [vmem:[#allocation30_spill] sm:$0xff] %v2324_v40 }
  0xe0   : > { %630 = vrot.lane.b32.xlu1 %v2320_v38, %s3662_s18  ;;  %627 = vrot.lane.b32.xlu0 %v2320_v38, %s3658_s8 }
  0xe2   : > { %v2330_v41 = vpop.permute.xlu1 %360  ;;  %v2332_v42 = vpop.permute.xlu0 %357 }
  0xe3   : > { %3716 = vst [vmem:[#allocation31_spill] sm:$0xff] %v2330_v41  ;;  %3717 = vst [vmem:[#allocation32_spill] sm:$0xff] %v2332_v42 }
  0xe4   : > { %636 = vrot.lane.b32.xlu1 %v2320_v38, %s3656_s17  ;;  %633 = vrot.lane.b32.xlu0 %v2320_v38, %s3652_s7 }
  0xe6   : > { %v2338_v43 = vpop.permute.xlu1 %366  ;;  %v2340_v44 = vpop.permute.xlu0 %363 }
  0xe7   : > { %3718 = vst [vmem:[#allocation33_spill] sm:$0xff] %v2338_v43  ;;  %3719 = vst [vmem:[#allocation34_spill] sm:$0xff] %v2340_v44 }
  0xe8   : > { %642 = vrot.lane.b32.xlu1 %v2320_v38, %s3660_s21  ;;  %639 = vrot.lane.b32.xlu0 %v2320_v38, %s3654_s24 }
  0xea   : > { %v2349_v46 = vpop.permute.xlu1 %372  ;;  %v2351_v47 = vpop.permute.xlu0 %369 }
  0xeb   : > { %3720 = vst [vmem:[#allocation35_spill] sm:$0xff] %v2349_v46  ;;  %3721 = vst [vmem:[#allocation36_spill] sm:$0xff] %v2351_v47 }
  0xec   : > { %666 = vrot.lane.b32.xlu1 %v2347_v45, %s3658_s8  ;;  %645 = vrot.lane.b32.xlu0 %v2320_v38, %s3722_s26 }
  0xee   : > { %v2357_v48 = vpop.permute.xlu1 %378  ;;  %v2359_v49 = vpop.permute.xlu0 %375 }
  0xef   : > { %3723 = vst [vmem:[#allocation37_spill] sm:$0xff] %v2357_v48  ;;  %3724 = vst [vmem:[#allocation38_spill] sm:$0xff] %v2359_v49 }
  0xf0   : > { %672 = vrot.lane.b32.xlu1 %v2347_v45, %s3652_s7  ;;  %669 = vrot.lane.b32.xlu0 %v2347_v45, %s3662_s18 }
  0xf2   : > { %v2365_v50 = vpop.permute.xlu1 %398  ;;  %v2367_v51 = vpop.permute.xlu0 %395 }
  0xf3   : > { %3725 = vst [vmem:[#allocation39_spill] sm:$0xff] %v2365_v50  ;;  %3726 = vst [vmem:[#allocation40_spill] sm:$0xff] %v2367_v51 }
  0xf4   : > { %678 = vrot.lane.b32.xlu1 %v2347_v45, %s3654_s24  ;;  %675 = vrot.lane.b32.xlu0 %v2347_v45, %s3656_s17 }
  0xf6   : > { %v2373_v52 = vpop.permute.xlu1 %404  ;;  %v2375_v53 = vpop.permute.xlu0 %401 }
  0xf7   : > { %3727 = vst [vmem:[#allocation41_spill] sm:$0xff] %v2373_v52  ;;  %3728 = vst [vmem:[#allocation42_spill] sm:$0xff] %v2375_v53 }
  0xf8   : > { %684 = vrot.lane.b32.xlu1 %v2347_v45, %s3722_s26  ;;  %681 = vrot.lane.b32.xlu0 %v2347_v45, %s3660_s21 }
  0xfa   : > { %v2384_v55 = vpop.permute.xlu1 %410  ;;  %v2386_v56 = vpop.permute.xlu0 %407 }
  0xfb   : > { %3729 = vst [vmem:[#allocation43_spill] sm:$0xff] %v2384_v55  ;;  %3730 = vst [vmem:[#allocation44_spill] sm:$0xff] %v2386_v56 }
  0xfc   : > { %708 = vrot.lane.b32.xlu1 %v2382_v54, %s3662_s18  ;;  %705 = vrot.lane.b32.xlu0 %v2382_v54, %s3658_s8 }
  0xfe   : > { %v2392_v57 = vpop.permute.xlu1 %416  ;;  %v2394_v58 = vpop.permute.xlu0 %413 }
  0xff   : > { %3731 = vst [vmem:[#allocation45_spill] sm:$0xff] %v2392_v57  ;;  %3732 = vst [vmem:[#allocation46_spill] sm:$0xff] %v2394_v58 }
 0x100   : > { %714 = vrot.lane.b32.xlu1 %v2382_v54, %s3656_s17  ;;  %711 = vrot.lane.b32.xlu0 %v2382_v54, %s3652_s7 }
 0x102   : > { %v2400_v59 = vpop.permute.xlu1 %436  ;;  %v2402_v60 = vpop.permute.xlu0 %433 }
 0x104   : > { %720 = vrot.lane.b32.xlu1 %v2382_v54, %s3660_s21  ;;  %717 = vrot.lane.b32.xlu0 %v2382_v54, %s3654_s24 }
 0x106   : > { %v2411_v62 = vpop.permute.xlu1 %442  ;;  %v2413_v63 = vpop.permute.xlu0 %439 }
 0x108   : > { %744 = vrot.lane.b32.xlu1 %v2409_v61, %s3658_s8  ;;  %723 = vrot.lane.b32.xlu0 %v2382_v54, %s3722_s26  ;;  %s3739_s8 = smov 31  }
 0x10a   : > { %v2419_v1 = vpop.permute.xlu1 %448  ;;  %v2421_v2 = vpop.permute.xlu0 %445 }
 0x10c   : > { %750 = vrot.lane.b32.xlu1 %v2409_v61, %s3652_s7  ;;  %747 = vrot.lane.b32.xlu0 %v2409_v61, %s3662_s18  ;;  %s3734_s7 = smov 15   ;;  %s3743_s18 = smov 63  }
 0x10e   : > { %v2427_v25 = vpop.permute.xlu1 %454  ;;  %v2429_v22 = vpop.permute.xlu0 %451 }
 0x110   : > { %756 = vrot.lane.b32.xlu1 %v2409_v61, %s3654_s24  ;;  %753 = vrot.lane.b32.xlu0 %v2409_v61, %s3656_s17  ;;  %s3735_s24 = smov 127   ;;  %s3738_s17 = smov 47  }
 0x112   : > { %v2435_v57 = vpop.permute.xlu1 %474  ;;  %v2437_v23 = vpop.permute.xlu0 %471 }
 0x114   : > { %762 = vrot.lane.b32.xlu1 %v2409_v61, %s3722_s26  ;;  %759 = vrot.lane.b32.xlu0 %v2409_v61, %s3660_s21  ;;  %s3742_s21 = smov 79  }
 0x116   : > { %v2443_v20 = vpop.permute.xlu1 %480  ;;  %v2445_v58 = vpop.permute.xlu0 %477 }
 0x117   : > { %3733 = vst [vmem:[#allocation47_spill] sm:$0xff] %v2443_v20 }
 0x118   : > { %782 = vrot.lane.b32.xlu1 %v2320_v38, %s3734_s7  ;;  %779 = vrot.lane.b32.xlu0 %v2320_v38, %s3735_s24 }
 0x11a   : > { %v2451_v55 = vpop.permute.xlu1 %486  ;;  %v2453_v21 = vpop.permute.xlu0 %483 }
 0x11b   : > { %3736 = vst [vmem:[#allocation48_spill] sm:$0xff] %v2451_v55  ;;  %3737 = vst [vmem:[#allocation49_spill] sm:$0xff] %v2453_v21 }
 0x11c   : > { %788 = vrot.lane.b32.xlu1 %v2320_v38, %s3738_s17  ;;  %785 = vrot.lane.b32.xlu0 %v2320_v38, %s3739_s8 }
 0x11e   : > { %v2459_v18 = vpop.permute.xlu1 %492  ;;  %v2461_v56 = vpop.permute.xlu0 %489 }
 0x11f   : > { %3740 = vst [vmem:[#allocation50_spill] sm:$0xff] %v2459_v18  ;;  %3741 = vst [vmem:[#allocation51_spill] sm:$0xff] %v2461_v56 }
 0x120   : > { %794 = vrot.lane.b32.xlu1 %v2320_v38, %s3742_s21  ;;  %791 = vrot.lane.b32.xlu0 %v2320_v38, %s3743_s18 }
 0x122   : > { %v2467_v52 = vpop.permute.xlu1 %512  ;;  %v2469_v19 = vpop.permute.xlu0 %509 }
 0x123   : > { %3744 = vst [vmem:[#allocation52_spill] sm:$0xff] %v2467_v52  ;;  %3745 = vst [vmem:[#allocation53_spill] sm:$0xff] %v2469_v19 }
 0x124   : > { %800 = vrot.lane.b32.xlu1 %v2320_v38, %s3746_s28  ;;  %797 = vrot.lane.b32.xlu0 %v2320_v38, %s3747_s29 }
 0x126   : > { %v2475_v53 = vpop.permute.xlu1 %518  ;;  %v2477_v51 = vpop.permute.xlu0 %515 }
 0x127   : > { %3748 = vst [vmem:[#allocation54_spill] sm:$0xff] %v2475_v53  ;;  %3749 = vst [vmem:[#allocation55_spill] sm:$0xff] %v2477_v51 }
 0x128   : > { %820 = vrot.lane.b32.xlu1 %v2347_v45, %s3734_s7  ;;  %817 = vrot.lane.b32.xlu0 %v2347_v45, %s3735_s24 }
 0x12a   : > { %v2483_v50 = vpop.permute.xlu1 %524  ;;  %v2485_v16 = vpop.permute.xlu0 %521 }
 0x12b   : > { %3750 = vst [vmem:[#allocation56_spill] sm:$0xff] %v2483_v50  ;;  %3751 = vst [vmem:[#allocation57_spill] sm:$0xff] %v2485_v16 }
 0x12c   : > { %826 = vrot.lane.b32.xlu1 %v2347_v45, %s3738_s17  ;;  %823 = vrot.lane.b32.xlu0 %v2347_v45, %s3739_s8 }
 0x12e   : > { %v2491_v48 = vpop.permute.xlu1 %530  ;;  %v2493_v53 = vpop.permute.xlu0 %527 }
 0x12f   : > { %3752 = vst [vmem:[#allocation58_spill] sm:$0xff] %v2491_v48  ;;  %3753 = vst [vmem:[#allocation59_spill] sm:$0xff] %v2493_v53 }
 0x130   : > { %832 = vrot.lane.b32.xlu1 %v2347_v45, %s3742_s21  ;;  %829 = vrot.lane.b32.xlu0 %v2347_v45, %s3743_s18 }
 0x132   : > { %v2499_v17 = vpop.permute.xlu1 %550  ;;  %v2501_v50 = vpop.permute.xlu0 %547 }
 0x133   : > { %3754 = vst [vmem:[#allocation60_spill] sm:$0xff] %v2499_v17  ;;  %3755 = vst [vmem:[#allocation61_spill] sm:$0xff] %v2501_v50 }
 0x134   : > { %838 = vrot.lane.b32.xlu1 %v2347_v45, %s3746_s28  ;;  %835 = vrot.lane.b32.xlu0 %v2347_v45, %s3747_s29 }
 0x136   : > { %v2507_v16 = vpop.permute.xlu1 %556  ;;  %v2509_v48 = vpop.permute.xlu0 %553 }
 0x137   : > { %3756 = vst [vmem:[#allocation62_spill] sm:$0xff] %v2507_v16  ;;  %3757 = vst [vmem:[#allocation63_spill] sm:$0xff] %v2509_v48 }
 0x138   : > { %858 = vrot.lane.b32.xlu1 %v2382_v54, %s3734_s7  ;;  %855 = vrot.lane.b32.xlu0 %v2382_v54, %s3735_s24 }
 0x13a   : > { %v2515_v53 = vpop.permute.xlu1 %562  ;;  %v2517_v17 = vpop.permute.xlu0 %559 }
 0x13b   : > { %3758 = vst [vmem:[#allocation64_spill] sm:$0xff] %v2515_v53  ;;  %3759 = vst [vmem:[#allocation65_spill] sm:$0xff] %v2517_v17 }
 0x13c   : > { %864 = vrot.lane.b32.xlu1 %v2382_v54, %s3738_s17  ;;  %861 = vrot.lane.b32.xlu0 %v2382_v54, %s3739_s8 }
 0x13e   : > { %v2523_v50 = vpop.permute.xlu1 %568  ;;  %v2525_v16 = vpop.permute.xlu0 %565 }
 0x13f   : > { %3760 = vst [vmem:[#allocation66_spill] sm:$0xff] %v2523_v50  ;;  %3761 = vst [vmem:[#allocation67_spill] sm:$0xff] %v2525_v16 }
 0x140   : > { %870 = vrot.lane.b32.xlu1 %v2382_v54, %s3742_s21  ;;  %867 = vrot.lane.b32.xlu0 %v2382_v54, %s3743_s18 }
 0x142   : > { %v2531_v48 = vpop.permute.xlu1 %588  ;;  %v2533_v53 = vpop.permute.xlu0 %585 }
 0x144   : > { %876 = vrot.lane.b32.xlu1 %v2382_v54, %s3746_s28  ;;  %873 = vrot.lane.b32.xlu0 %v2382_v54, %s3747_s29 }
 0x146   : > { %v2539_v17 = vpop.permute.xlu1 %594  ;;  %v2541_v50 = vpop.permute.xlu0 %591 }
 0x148   : > { %896 = vrot.lane.b32.xlu1 %v2409_v61, %s3734_s7  ;;  %893 = vrot.lane.b32.xlu0 %v2409_v61, %s3735_s24 }
 0x14a   : > { %v2547_v16 = vpop.permute.xlu1 %600  ;;  %v2549_v49 = vpop.permute.xlu0 %597 }
 0x14c   : > { %902 = vrot.lane.b32.xlu1 %v2409_v61, %s3738_s17  ;;  %899 = vrot.lane.b32.xlu0 %v2409_v61, %s3739_s8 }
 0x14e   : > { %v2555_v51 = vpop.permute.xlu1 %606  ;;  %v2557_v46 = vpop.permute.xlu0 %603 }
 0x14f   : > { %3762 = vst [vmem:[#allocation68_spill] sm:$0xff] %v2555_v51 }
 0x150   : > { %908 = vrot.lane.b32.xlu1 %v2409_v61, %s3742_s21  ;;  %905 = vrot.lane.b32.xlu0 %v2409_v61, %s3743_s18 }
 0x152   : > { %v2563_v19 = vpop.permute.xlu1 %630  ;;  %v2565_v52 = vpop.permute.xlu0 %627 }
 0x153   : > { %3763 = vst [vmem:[#allocation69_spill] sm:$0xff] %v2563_v19  ;;  %3764 = vst [vmem:[#allocation70_spill] sm:$0xff] %v2565_v52 }
 0x154   : > { %914 = vrot.lane.b32.xlu1 %v2409_v61, %s3746_s28  ;;  %911 = vrot.lane.b32.xlu0 %v2409_v61, %s3747_s29 }
 0x156   : > { %v2571_v14 = vpop.permute.xlu1 %636  ;;  %v2573_v47 = vpop.permute.xlu0 %633 }
 0x157   : > { %3765 = vst [vmem:[#allocation71_spill] sm:$0xff] %v2571_v14  ;;  %3766 = vst [vmem:[#allocation72_spill] sm:$0xff] %v2573_v47 }
 0x158   : > { %934 = vrot.lane.b32.xlu1 %v2320_v38, %s3668_s30  ;;  %931 = vrot.lane.b32.xlu0 %v2320_v38, %s3670_s3  ;;  %s3771_s30 = smov 62   ;;  %s3774_s3 = smov 110  }
 0x15a   : > { %v2579_v43 = vpop.permute.xlu1 %642  ;;  %v2581_v18 = vpop.permute.xlu0 %639 }
 0x15b   : > { %3767 = vst [vmem:[#allocation73_spill] sm:$0xff] %v2579_v43  ;;  %3768 = vst [vmem:[#allocation74_spill] sm:$0xff] %v2581_v18 }
 0x15c   : > { %940 = vrot.lane.b32.xlu1 %v2320_v38, %s3672_s5  ;;  %937 = vrot.lane.b32.xlu0 %v2320_v38, %s3674_s25  ;;  %s3775_s5 = smov 94   ;;  %s3778_s25 = smov 14  }
 0x15e   : > { %v2587_v44 = vpop.permute.xlu1 %666  ;;  %v2589_v14 = vpop.permute.xlu0 %645 }
 0x15f   : > { %3769 = vst [vmem:[#allocation75_spill] sm:$0xff] %v2587_v44  ;;  %3770 = vst [vmem:[#allocation76_spill] sm:$0xff] %v2589_v14 }
 0x160   : > { %946 = vrot.lane.b32.xlu1 %v2320_v38, %s3676_s4  ;;  %943 = vrot.lane.b32.xlu0 %v2320_v38, %s3771_s30  ;;  %s3779_s4 = smov 126  }
 0x162   : > { %v2595_v42 = vpop.permute.xlu1 %672  ;;  %v2597_v43 = vpop.permute.xlu0 %669 }
 0x163   : > { %3772 = vst [vmem:[#allocation77_spill] sm:$0xff] %v2595_v42  ;;  %3773 = vst [vmem:[#allocation78_spill] sm:$0xff] %v2597_v43 }
 0x164   : > { %952 = vrot.lane.b32.xlu1 %v2320_v38, %s3774_s3  ;;  %949 = vrot.lane.b32.xlu0 %v2320_v38, %s3775_s5 }
 0x166   : > { %v2603_v18 = vpop.permute.xlu1 %678  ;;  %v2605_v44 = vpop.permute.xlu0 %675 }
 0x167   : > { %3776 = vst [vmem:[#allocation79_spill] sm:$0xff] %v2603_v18  ;;  %3777 = vst [vmem:[#allocation80_spill] sm:$0xff] %v2605_v44 }
 0x168   : > { %972 = vrot.lane.b32.xlu1 %v2347_v45, %s3778_s25  ;;  %969 = vrot.lane.b32.xlu0 %v2347_v45, %s3779_s4 }
 0x16a   : > { %v2611_v14 = vpop.permute.xlu1 %684  ;;  %v2613_v42 = vpop.permute.xlu0 %681 }
 0x16b   : > { %3780 = vst [vmem:[#allocation81_spill] sm:$0xff] %v2611_v14  ;;  %3781 = vst [vmem:[#allocation82_spill] sm:$0xff] %v2613_v42 }
 0x16c   : > { %978 = vrot.lane.b32.xlu1 %v2347_v45, %s3782_s0  ;;  %975 = vrot.lane.b32.xlu0 %v2347_v45, %s3783_s20 }
 0x16e   : > { %v2619_v43 = vpop.permute.xlu1 %708  ;;  %v2621_v18 = vpop.permute.xlu0 %705 }
 0x16f   : > { %3784 = vst [vmem:[#allocation83_spill] sm:$0xff] %v2619_v43  ;;  %3785 = vst [vmem:[#allocation84_spill] sm:$0xff] %v2621_v18 }
 0x170   : > { %984 = vrot.lane.b32.xlu1 %v2347_v45, %s3786_s19  ;;  %981 = vrot.lane.b32.xlu0 %v2347_v45, %s3771_s30 }
 0x172   : > { %v2627_v44 = vpop.permute.xlu1 %714  ;;  %v2629_v14 = vpop.permute.xlu0 %711 }
 0x173   : > { %3787 = vst [vmem:[#allocation85_spill] sm:$0xff] %v2627_v44  ;;  %3788 = vst [vmem:[#allocation86_spill] sm:$0xff] %v2629_v14 }
 0x174   : > { %990 = vrot.lane.b32.xlu1 %v2347_v45, %s3774_s3  ;;  %987 = vrot.lane.b32.xlu0 %v2347_v45, %s3775_s5 }
 0x176   : > { %v2635_v42 = vpop.permute.xlu1 %720  ;;  %v2637_v43 = vpop.permute.xlu0 %717 }
 0x177   : > { %3789 = vst [vmem:[#allocation87_spill] sm:$0xff] %v2635_v42  ;;  %3790 = vst [vmem:[#allocation88_spill] sm:$0xff] %v2637_v43 }
 0x178   : > { %1010 = vrot.lane.b32.xlu1 %v2382_v54, %s3778_s25  ;;  %1007 = vrot.lane.b32.xlu0 %v2382_v54, %s3779_s4 }
 0x17a   : > { %v2643_v18 = vpop.permute.xlu1 %744  ;;  %v2645_v44 = vpop.permute.xlu0 %723 }
 0x17b   : > { %3791 = vst [vmem:[#allocation89_spill] sm:$0xff] %v2645_v44 }
 0x17c   : > { %1016 = vrot.lane.b32.xlu1 %v2382_v54, %s3782_s0  ;;  %1013 = vrot.lane.b32.xlu0 %v2382_v54, %s3783_s20 }
 0x17e   : > { %v2651_v45 = vpop.permute.xlu1 %750  ;;  %v2653_v42 = vpop.permute.xlu0 %747 }
 0x180   : > { %1022 = vrot.lane.b32.xlu1 %v2382_v54, %s3786_s19  ;;  %1019 = vrot.lane.b32.xlu0 %v2382_v54, %s3771_s30 }
 0x182   : > { %v2659_v43 = vpop.permute.xlu1 %756  ;;  %v2661_v14 = vpop.permute.xlu0 %753 }
 0x184   : > { %1028 = vrot.lane.b32.xlu1 %v2382_v54, %s3774_s3  ;;  %1025 = vrot.lane.b32.xlu0 %v2382_v54, %s3775_s5 }
 0x186   : > { %v2667_v44 = vpop.permute.xlu1 %762  ;;  %v2669_v41 = vpop.permute.xlu0 %759 }
 0x187   : > { %3792 = vst [vmem:[#allocation90_spill] sm:$0xff] %v2667_v44  ;;  %3793 = vst [vmem:[#allocation91_spill] sm:$0xff] %v2669_v41 }
 0x188   : > { %1048 = vrot.lane.b32.xlu1 %v2409_v61, %s3778_s25  ;;  %1045 = vrot.lane.b32.xlu0 %v2409_v61, %s3779_s4 }
 0x18a   : > { %v2675_v39 = vpop.permute.xlu1 %782  ;;  %v2677_v47 = vpop.permute.xlu0 %779 }
 0x18b   : > { %3794 = vst [vmem:[#allocation92_spill] sm:$0xff] %v2675_v39  ;;  %3795 = vst [vmem:[#allocation93_spill] sm:$0xff] %v2677_v47 }
 0x18c   : > { %1054 = vrot.lane.b32.xlu1 %v2409_v61, %s3782_s0  ;;  %1051 = vrot.lane.b32.xlu0 %v2409_v61, %s3783_s20 }
 0x18e   : > { %v2683_v54 = vpop.permute.xlu1 %788  ;;  %v2685_v19 = vpop.permute.xlu0 %785 }
 0x18f   : > { %3796 = vst [vmem:[#allocation94_spill] sm:$0xff] %v2683_v54  ;;  %3797 = vst [vmem:[#allocation95_spill] sm:$0xff] %v2685_v19  ;;  %v2700_v54 = vld [vmem:[%s2053_s6 + $0x2] sm:$0xff] }
 0x190   : > { %1060 = vrot.lane.b32.xlu1 %v2409_v61, %s3786_s19  ;;  %1057 = vrot.lane.b32.xlu0 %v2409_v61, %s3771_s30 }
 0x192   : > { %v2691_v56 = vpop.permute.xlu1 %794  ;;  %v2693_v39 = vpop.permute.xlu0 %791 }
 0x193   : > { %3798 = vst [vmem:[#allocation96_spill] sm:$0xff] %v2691_v56  ;;  %3799 = vst [vmem:[#allocation97_spill] sm:$0xff] %v2693_v39 }
 0x194   : > { %1066 = vrot.lane.b32.xlu1 %v2409_v61, %s3774_s3  ;;  %1063 = vrot.lane.b32.xlu0 %v2409_v61, %s3775_s5 }
 0x196   : > { %v2702_v19 = vpop.permute.xlu1 %800  ;;  %v2704_v47 = vpop.permute.xlu0 %797 }
 0x197   : > { %3800 = vst [vmem:[#allocation98_spill] sm:$0xff] %v2702_v19  ;;  %3801 = vst [vmem:[#allocation99_spill] sm:$0xff] %v2704_v47  ;;  %v2727_v47 = vld [vmem:[%s2053_s6 + $0x1a] sm:$0xff] }
 0x198   : > { %1090 = vrot.lane.b32.xlu1 %v2700_v54, %s3802_s15  ;;  %1087 = vrot.lane.b32.xlu0 %v2700_v54, %s3803_s14 }
 0x19a   : > { %v2710_v56 = vpop.permute.xlu1 %820  ;;  %v2712_v39 = vpop.permute.xlu0 %817 }
 0x19b   : > { %3804 = vst [vmem:[#allocation100_spill] sm:$0xff] %v2710_v56  ;;  %3805 = vst [vmem:[#allocation101_spill] sm:$0xff] %v2712_v39 }
 0x19c   : > { %1096 = vrot.lane.b32.xlu1 %v2700_v54, %s3806_s27  ;;  %1093 = vrot.lane.b32.xlu0 %v2700_v54, %s3807_s11 }
 0x19e   : > { %v2718_v55 = vpop.permute.xlu1 %826  ;;  %v2720_v19 = vpop.permute.xlu0 %823 }
 0x19f   : > { %3808 = vst [vmem:[#allocation102_spill] sm:$0xff] %v2718_v55  ;;  %3809 = vst [vmem:[#allocation103_spill] sm:$0xff] %v2720_v19 }
 0x1a0   : > { %1102 = vrot.lane.b32.xlu1 %v2700_v54, %s3810_s23  ;;  %1099 = vrot.lane.b32.xlu0 %v2700_v54, %s3811_s9 }
 0x1a2   : > { %v2729_v56 = vpop.permute.xlu1 %832  ;;  %v2731_v39 = vpop.permute.xlu0 %829 }
 0x1a3   : > { %3812 = vst [vmem:[#allocation104_spill] sm:$0xff] %v2729_v56  ;;  %3813 = vst [vmem:[#allocation105_spill] sm:$0xff] %v2731_v39 }
 0x1a4   : > { %1126 = vrot.lane.b32.xlu1 %v2727_v47, %s3803_s14  ;;  %1105 = vrot.lane.b32.xlu0 %v2700_v54, %s3722_s26 }
 0x1a6   : > { %v2737_v55 = vpop.permute.xlu1 %838  ;;  %v2739_v19 = vpop.permute.xlu0 %835 }
 0x1a7   : > { %3814 = vst [vmem:[#allocation106_spill] sm:$0xff] %v2737_v55  ;;  %3815 = vst [vmem:[#allocation107_spill] sm:$0xff] %v2739_v19 }
 0x1a8   : > { %1132 = vrot.lane.b32.xlu1 %v2727_v47, %s3807_s11  ;;  %1129 = vrot.lane.b32.xlu0 %v2727_v47, %s3802_s15 }
 0x1aa   : > { %v2745_v56 = vpop.permute.xlu1 %858  ;;  %v2747_v40 = vpop.permute.xlu0 %855 }
 0x1ab   : > { %3816 = vst [vmem:[#allocation108_spill] sm:$0xff] %v2745_v56  ;;  %3817 = vst [vmem:[#allocation109_spill] sm:$0xff] %v2747_v40  ;;  %v2762_v56 = vld [vmem:[%s2053_s6 + $0x32] sm:$0xff] }
 0x1ac   : > { %1138 = vrot.lane.b32.xlu1 %v2727_v47, %s3811_s9  ;;  %1135 = vrot.lane.b32.xlu0 %v2727_v47, %s3806_s27 }
 0x1ae   : > { %v2753_v39 = vpop.permute.xlu1 %864  ;;  %v2755_v55 = vpop.permute.xlu0 %861 }
 0x1af   : > { %3818 = vst [vmem:[#allocation110_spill] sm:$0xff] %v2753_v39  ;;  %3819 = vst [vmem:[#allocation111_spill] sm:$0xff] %v2755_v55 }
 0x1b0   : > { %1144 = vrot.lane.b32.xlu1 %v2727_v47, %s3722_s26  ;;  %1141 = vrot.lane.b32.xlu0 %v2727_v47, %s3810_s23 }
 0x1b2   : > { %v2764_v40 = vpop.permute.xlu1 %870  ;;  %v2766_v19 = vpop.permute.xlu0 %867 }
 0x1b3   : > { %3820 = vst [vmem:[#allocation112_spill] sm:$0xff] %v2764_v40  ;;  %3821 = vst [vmem:[#allocation113_spill] sm:$0xff] %v2766_v19  ;;  %v2789_v19 = vld [vmem:[%s2053_s6 + $0x4a] sm:$0xff] }
 0x1b4   : > { %1168 = vrot.lane.b32.xlu1 %v2762_v56, %s3802_s15  ;;  %1165 = vrot.lane.b32.xlu0 %v2762_v56, %s3803_s14 }
 0x1b6   : > { %v2772_v39 = vpop.permute.xlu1 %876  ;;  %v2774_v55 = vpop.permute.xlu0 %873 }
 0x1b7   : > { %3822 = vst [vmem:[#allocation114_spill] sm:$0xff] %v2772_v39  ;;  %3823 = vst [vmem:[#allocation115_spill] sm:$0xff] %v2774_v55 }
 0x1b8   : > { %1174 = vrot.lane.b32.xlu1 %v2762_v56, %s3806_s27  ;;  %1171 = vrot.lane.b32.xlu0 %v2762_v56, %s3807_s11 }
 0x1ba   : > { %v2780_v15 = vpop.permute.xlu1 %896  ;;  %v2782_v40 = vpop.permute.xlu0 %893 }
 0x1bc   : > { %1180 = vrot.lane.b32.xlu1 %v2762_v56, %s3810_s23  ;;  %1177 = vrot.lane.b32.xlu0 %v2762_v56, %s3811_s9 }
 0x1be   : > { %v2791_v39 = vpop.permute.xlu1 %902  ;;  %v2793_v55 = vpop.permute.xlu0 %899 }
 0x1c0   : > { %1204 = vrot.lane.b32.xlu1 %v2789_v19, %s3803_s14  ;;  %1183 = vrot.lane.b32.xlu0 %v2762_v56, %s3722_s26 }
 0x1c2   : > { %v2799_v38 = vpop.permute.xlu1 %908  ;;  %v2801_v52 = vpop.permute.xlu0 %905 }
 0x1c3   : > { %3824 = vst [vmem:[#allocation116_spill] sm:$0xff] %v2799_v38 }
 0x1c4   : > { %1210 = vrot.lane.b32.xlu1 %v2789_v19, %s3807_s11  ;;  %1207 = vrot.lane.b32.xlu0 %v2789_v19, %s3802_s15 }
 0x1c6   : > { %v2807_v36 = vpop.permute.xlu1 %914  ;;  %v2809_v12 = vpop.permute.xlu0 %911 }
 0x1c7   : > { %3825 = vst [vmem:[#allocation117_spill] sm:$0xff] %v2807_v36  ;;  %3826 = vst [vmem:[#allocation118_spill] sm:$0xff] %v2809_v12 }
 0x1c8   : > { %1216 = vrot.lane.b32.xlu1 %v2789_v19, %s3811_s9  ;;  %1213 = vrot.lane.b32.xlu0 %v2789_v19, %s3806_s27 }
 0x1ca   : > { %v2815_v44 = vpop.permute.xlu1 %934  ;;  %v2817_v21 = vpop.permute.xlu0 %931 }
 0x1cb   : > { %3827 = vst [vmem:[#allocation119_spill] sm:$0xff] %v2815_v44  ;;  %3828 = vst [vmem:[#allocation120_spill] sm:$0xff] %v2817_v21 }
 0x1cc   : > { %1222 = vrot.lane.b32.xlu1 %v2789_v19, %s3722_s26  ;;  %1219 = vrot.lane.b32.xlu0 %v2789_v19, %s3810_s23 }
 0x1ce   : > { %v2823_v20 = vpop.permute.xlu1 %940  ;;  %v2825_v36 = vpop.permute.xlu0 %937 }
 0x1cf   : > { %3829 = vst [vmem:[#allocation121_spill] sm:$0xff] %v2823_v20  ;;  %3830 = vst [vmem:[#allocation122_spill] sm:$0xff] %v2825_v36 }
 0x1d0   : > { %1242 = vrot.lane.b32.xlu1 %v2700_v54, %s3734_s7  ;;  %1239 = vrot.lane.b32.xlu0 %v2700_v54, %s3735_s24 }
 0x1d2   : > { %v2831_v12 = vpop.permute.xlu1 %946  ;;  %v2833_v44 = vpop.permute.xlu0 %943 }
 0x1d3   : > { %3831 = vst [vmem:[#allocation123_spill] sm:$0xff] %v2831_v12  ;;  %3832 = vst [vmem:[#allocation124_spill] sm:$0xff] %v2833_v44 }
 0x1d4   : > { %1248 = vrot.lane.b32.xlu1 %v2700_v54, %s3738_s17  ;;  %1245 = vrot.lane.b32.xlu0 %v2700_v54, %s3739_s8 }
 0x1d6   : > { %v2839_v21 = vpop.permute.xlu1 %952  ;;  %v2841_v20 = vpop.permute.xlu0 %949 }
 0x1d7   : > { %3833 = vst [vmem:[#allocation125_spill] sm:$0xff] %v2839_v21  ;;  %3834 = vst [vmem:[#allocation126_spill] sm:$0xff] %v2841_v20 }
 0x1d8   : > { %1254 = vrot.lane.b32.xlu1 %v2700_v54, %s3742_s21  ;;  %1251 = vrot.lane.b32.xlu0 %v2700_v54, %s3743_s18 }
 0x1da   : > { %v2847_v36 = vpop.permute.xlu1 %972  ;;  %v2849_v12 = vpop.permute.xlu0 %969 }
 0x1db   : > { %3835 = vst [vmem:[#allocation127_spill] sm:$0xff] %v2847_v36  ;;  %3836 = vst [vmem:[#allocation128_spill] sm:$0xff] %v2849_v12 }
 0x1dc   : > { %1260 = vrot.lane.b32.xlu1 %v2700_v54, %s3746_s28  ;;  %1257 = vrot.lane.b32.xlu0 %v2700_v54, %s3747_s29 }
 0x1de   : > { %v2855_v44 = vpop.permute.xlu1 %978  ;;  %v2857_v21 = vpop.permute.xlu0 %975 }
 0x1df   : > { %3837 = vst [vmem:[#allocation129_spill] sm:$0xff] %v2855_v44  ;;  %3838 = vst [vmem:[#allocation130_spill] sm:$0xff] %v2857_v21 }
 0x1e0   : > { %1280 = vrot.lane.b32.xlu1 %v2727_v47, %s3734_s7  ;;  %1277 = vrot.lane.b32.xlu0 %v2727_v47, %s3735_s24 }
 0x1e2   : > { %v2863_v20 = vpop.permute.xlu1 %984  ;;  %v2865_v36 = vpop.permute.xlu0 %981 }
 0x1e3   : > { %3839 = vst [vmem:[#allocation131_spill] sm:$0xff] %v2863_v20  ;;  %3840 = vst [vmem:[#allocation132_spill] sm:$0xff] %v2865_v36 }
 0x1e4   : > { %1286 = vrot.lane.b32.xlu1 %v2727_v47, %s3738_s17  ;;  %1283 = vrot.lane.b32.xlu0 %v2727_v47, %s3739_s8 }
 0x1e6   : > { %v2871_v12 = vpop.permute.xlu1 %990  ;;  %v2873_v44 = vpop.permute.xlu0 %987 }
 0x1e7   : > { %3841 = vst [vmem:[#allocation133_spill] sm:$0xff] %v2871_v12  ;;  %3842 = vst [vmem:[#allocation134_spill] sm:$0xff] %v2873_v44 }
 0x1e8   : > { %1292 = vrot.lane.b32.xlu1 %v2727_v47, %s3742_s21  ;;  %1289 = vrot.lane.b32.xlu0 %v2727_v47, %s3743_s18 }
 0x1ea   : > { %v2879_v21 = vpop.permute.xlu1 %1010  ;;  %v2881_v20 = vpop.permute.xlu0 %1007 }
 0x1eb   : > { %3843 = vst [vmem:[#allocation135_spill] sm:$0xff] %v2879_v21  ;;  %3844 = vst [vmem:[#allocation136_spill] sm:$0xff] %v2881_v20 }
 0x1ec   : > { %1298 = vrot.lane.b32.xlu1 %v2727_v47, %s3746_s28  ;;  %1295 = vrot.lane.b32.xlu0 %v2727_v47, %s3747_s29 }
 0x1ee   : > { %v2887_v36 = vpop.permute.xlu1 %1016  ;;  %v2889_v12 = vpop.permute.xlu0 %1013 }
 0x1ef   : > { %3845 = vst [vmem:[#allocation137_spill] sm:$0xff] %v2887_v36  ;;  %3846 = vst [vmem:[#allocation138_spill] sm:$0xff] %v2889_v12 }
 0x1f0   : > { %1318 = vrot.lane.b32.xlu1 %v2762_v56, %s3734_s7  ;;  %1315 = vrot.lane.b32.xlu0 %v2762_v56, %s3735_s24 }
 0x1f2   : > { %v2895_v44 = vpop.permute.xlu1 %1022  ;;  %v2897_v21 = vpop.permute.xlu0 %1019 }
 0x1f3   : > { %3847 = vst [vmem:[#allocation139_spill] sm:$0xff] %v2895_v44  ;;  %3848 = vst [vmem:[#allocation140_spill] sm:$0xff] %v2897_v21 }
 0x1f4   : > { %1324 = vrot.lane.b32.xlu1 %v2762_v56, %s3738_s17  ;;  %1321 = vrot.lane.b32.xlu0 %v2762_v56, %s3739_s8 }
 0x1f6   : > { %v2903_v20 = vpop.permute.xlu1 %1028  ;;  %v2905_v36 = vpop.permute.xlu0 %1025 }
 0x1f7   : > { %3849 = vst [vmem:[#allocation141_spill] sm:$0xff] %v2903_v20  ;;  %3850 = vst [vmem:[#allocation142_spill] sm:$0xff] %v2905_v36 }
 0x1f8   : > { %1330 = vrot.lane.b32.xlu1 %v2762_v56, %s3742_s21  ;;  %1327 = vrot.lane.b32.xlu0 %v2762_v56, %s3743_s18 }
 0x1fa   : > { %v1049_v12 = vpop.permute.xlu1 %1048  ;;  %v1046_v44 = vpop.permute.xlu0 %1045 }
 0x1fb   : > { %v1069_v20 = vsel %vm181_vm0, %v1046_v44, %v1049_v12 }
 0x1fc   : > { %1336 = vrot.lane.b32.xlu1 %v2762_v56, %s3746_s28  ;;  %1333 = vrot.lane.b32.xlu0 %v2762_v56, %s3747_s29 }
 0x1fe   : > { %v1055_v21 = vpop.permute.xlu1 %1054  ;;  %v1052_v36 = vpop.permute.xlu0 %1051 }
 0x1ff   : > { %v1070_v38 = vsel %vm183_vm1, %v1069_v20, %v1052_v36 }
 0x200   : > { %1391 = vrot.lane.b32.xlu1 %v2700_v54, %s3779_s4  ;;  %1353 = vrot.lane.b32.xlu0 %v2789_v19, %s3735_s24  ;;  %v1071_v37 = vsel %vm185_vm2, %v1070_v38, %v1055_v21 }
 0x202   : > { %v1061_v41 = vpop.permute.xlu1 %1060  ;;  %v1058_v51 = vpop.permute.xlu0 %1057 }
 0x203   : > { %v1072_v34 = vsel %vm187_vm3, %v1071_v37, %v1058_v51 }
 0x204   : > { %1429 = vrot.lane.b32.xlu1 %v2727_v47, %s3779_s4  ;;  %1394 = vrot.lane.b32.xlu0 %v2700_v54, %s3778_s25  ;;  %v1073_v12 = vsel %vm189_vm4, %v1072_v34, %v1061_v41 }
 0x206   : > { %v1067_v20 = vpop.permute.xlu1 %1066  ;;  %v1064_v36 = vpop.permute.xlu0 %1063 }
 0x207   : > { %v1074_v21 = vsel %vm191_vm5, %v1073_v12, %v1064_v36 }
 0x208   : > { %v2930_v38 = vsel %vm193_vm6, %v1074_v21, %v1067_v20  ;;  %1397 = vrot.lane.b32.xlu1 %v2700_v54, %s3783_s20  ;;  %1432 = vrot.lane.b32.xlu0 %v2727_v47, %s3778_s25 }
 0x209   : > { %3851 = vst [vmem:[#allocation143_spill] sm:$0xff] %v2930_v38 }
 0x20a   : > { %v1091_v37 = vpop.permute.xlu1 %1090  ;;  %v1088_v44 = vpop.permute.xlu0 %1087 }
 0x20b   : > { %v1108_v34 = vsel %vm181_vm0, %v2700_v54, %v1088_v44 }
 0x20c   : > { %1356 = vrot.lane.b32.xlu1 %v2789_v19, %s3734_s7  ;;  %1435 = vrot.lane.b32.xlu0 %v2727_v47, %s3783_s20  ;;  %v1109_v41 = vsel %vm183_vm1, %v1108_v34, %v1091_v37 }
 0x20e   : > { %v1097_v51 = vpop.permute.xlu1 %1096  ;;  %v1094_v12 = vpop.permute.xlu0 %1093 }
 0x20f   : > { %v1110_v20 = vsel %vm185_vm2, %v1109_v41, %v1094_v12 }
 0x210   : > { %1438 = vrot.lane.b32.xlu1 %v2727_v47, %s3782_s0  ;;  %1400 = vrot.lane.b32.xlu0 %v2700_v54, %s3782_s0  ;;  %v1111_v36 = vsel %vm187_vm3, %v1110_v20, %v1097_v51 }
 0x212   : > { %v1103_v21 = vpop.permute.xlu1 %1102  ;;  %v1100_v44 = vpop.permute.xlu0 %1099 }
 0x213   : > { %v1112_v38 = vsel %vm189_vm4, %v1111_v36, %v1100_v44 }
 0x214   : > { %1470 = vrot.lane.b32.xlu1 %v2762_v56, %s3778_s25  ;;  %1467 = vrot.lane.b32.xlu0 %v2762_v56, %s3779_s4  ;;  %v1113_v37 = vsel %vm191_vm5, %v1112_v38, %v1103_v21  ;;  %v182_v21 = vsel %vm181_vm0, %v2056_v0, %v2185_v5 }
 0x216   : > { %v1127_v34 = vpop.permute.xlu1 %1126  ;;  %v1106_v41 = vpop.permute.xlu0 %1105 }
 0x217   : > { %v2956_v12 = vsel %vm193_vm6, %v1113_v37, %v1106_v41  ;;  %v1147_v51 = vsel %vm181_vm0, %v2727_v47, %v1127_v34  ;;  %v184_v34 = vsel %vm183_vm1, %v182_v21, %v2193_v7 }
 0x218   : > { %3852 = vst [vmem:[#allocation144_spill] sm:$0xff] %v2956_v12  ;;  %1403 = vrot.lane.b32.xlu1 %v2700_v54, %s3771_s30  ;;  %1359 = vrot.lane.b32.xlu0 %v2789_v19, %s3739_s8 }
 0x21a   : > { %v1133_v20 = vpop.permute.xlu1 %1132  ;;  %v1130_v36 = vpop.permute.xlu0 %1129 }
 0x21b   : > { %v1148_v44 = vsel %vm183_vm1, %v1147_v51, %v1130_v36 }
 0x21c   : > { %1473 = vrot.lane.b32.xlu1 %v2762_v56, %s3783_s20  ;;  %1441 = vrot.lane.b32.xlu0 %v2727_v47, %s3771_s30  ;;  %v1149_v38 = vsel %vm185_vm2, %v1148_v44, %v1133_v20  ;;  %v186_v20 = vsel %vm185_vm2, %v184_v34, %v2183_v4  ;;  %v305_v4 = vsel %vm181_vm0, %v2105_v3, %v2263_v24 }
 0x21d   : > { %v188_v7 = vsel %vm187_vm3, %v186_v20, %v2191_v6  ;;  %v609_v6 = vsel %vm181_vm0, %v2533_v53, %v2531_v48  ;;  %v343_v20 = vsel %vm181_vm0, %v2297_v33, %v2295_v32 }
 0x21e   : > { %v1139_v37 = vpop.permute.xlu1 %1138  ;;  %v1136_v41 = vpop.permute.xlu0 %1135  ;;  %v190_v3 = vsel %vm189_vm4, %v188_v7, %v2201_v9  ;;  %v610_v24 = vsel %vm183_vm1, %v609_v6, %v2541_v50  ;;  %v1688_v7 = vld [vmem:[%s3630_s1 + $0x3] ss:$0 sm:$0xff] }
 0x21f   : > { %v1150_v12 = vsel %vm187_vm3, %v1149_v38, %v1136_v41  ;;  %v306_v38 = vsel %vm183_vm1, %v305_v4, %v2273_v27  ;;  %v3856_v6 = vld [vmem:[#allocation27_spill] sm:$0xff] }
 0x220   : > { %1406 = vrot.lane.b32.xlu1 %v2700_v54, %s3786_s19  ;;  %1362 = vrot.lane.b32.xlu0 %v2789_v19, %s3738_s17  ;;  %v1151_v51 = vsel %vm189_vm4, %v1150_v12, %v1139_v37  ;;  %v457_v12 = vsel %vm181_vm0, %v2402_v60, %v2400_v59  ;;  %v307_v48 = vsel %vm185_vm2, %v306_v38, %v2271_v26 }
 0x221   : > { %v458_v21 = vsel %vm183_vm1, %v457_v12, %v2413_v63  ;;  %v308_v9 = vsel %vm187_vm3, %v307_v48, %v2281_v29  ;;  %v765_v59 = vsel %vm181_vm0, %v2409_v61, %v2643_v18  ;;  %v611_v26 = vsel %vm185_vm2, %v610_v24, %v2539_v17  ;;  %v1837_v17 = vld [vmem:[%s2053_s6 + $0x18] sm:$0xff]  ;;  %v3853_v12 = vld [vmem:[#allocation25_spill] sm:$0xff] }
 0x222   : > { %v1145_v36 = vpop.permute.xlu1 %1144  ;;  %v1142_v0 = vpop.permute.xlu0 %1141  ;;  %v459_v53 = vsel %vm185_vm2, %v458_v21, %v2411_v62  ;;  %v766_v62 = vsel %vm183_vm1, %v765_v59, %v2653_v42  ;;  %v917_v18 = vsel %vm181_vm0, %v2782_v40, %v2780_v15  ;;  %v227_v42 = vsel %vm181_vm0, %v1837_v17, %v2207_v10  ;;  %v3854_v21 = vld [vmem:[#allocation68_spill] sm:$0xff]  ;;  %v3862_v17 = vld [vmem:[#allocation13_spill] sm:$0xff] }
 0x223   : > { %v1152_v5 = vsel %vm191_vm5, %v1151_v51, %v1142_v0  ;;  %v460_v50 = vsel %vm187_vm3, %v459_v53, %v2421_v2  ;;  %v192_v51 = vsel %vm191_vm5, %v190_v3, %v2199_v8  ;;  %v612_v2 = vsel %vm187_vm3, %v611_v26, %v2549_v49  ;;  %v3857_v3 = vld [vmem:[#allocation116_spill] sm:$0xff]  ;;  %v3858_v53 = vld [vmem:[#allocation47_spill] sm:$0xff] }
 0x224   : > { %v2985_v44 = vsel %vm193_vm6, %v1152_v5, %v1145_v36  ;;  %1476 = vrot.lane.b32.xlu1 %v2762_v56, %s3782_s0  ;;  %1444 = vrot.lane.b32.xlu0 %v2727_v47, %s3786_s19  ;;  %v309_v61 = vsel %vm189_vm4, %v308_v9, %v2279_v28  ;;  %v461_v49 = vsel %vm189_vm4, %v460_v50, %v2419_v1  ;;  %v3859_v50 = vld [vmem:[#allocation118_spill] sm:$0xff]  ;;  %v1708_v26 = vld [vmem:[%s3630_s1 + $0xf] ss:$0 sm:$0xff] }
 0x225   : > { %v918_v15 = vsel %vm183_vm1, %v917_v18, %v2793_v55  ;;  %v310_v40 = vsel %vm191_vm5, %v309_v61, %v2289_v31  ;;  %v462_v36 = vsel %vm191_vm5, %v461_v49, %v2429_v22  ;;  %v767_v10 = vsel %vm185_vm2, %v766_v62, %v2651_v45  ;;  %v1679_v45 = vld [vmem:[%s3630_s1] ss:$0 sm:$0xff]  ;;  %v3861_v62 = vld [vmem:[#allocation90_spill] sm:$0xff] }
 0x226   : > { %v1169_v37 = vpop.permute.xlu1 %1168  ;;  %v1166_v41 = vpop.permute.xlu0 %1165  ;;  %v344_v1 = vsel %vm183_vm1, %v343_v20, %v2305_v35  ;;  %v613_v55 = vsel %vm189_vm4, %v612_v2, %v2547_v16  ;;  %v768_v31 = vsel %vm187_vm3, %v767_v10, %v2661_v14  ;;  %v919_v22 = vsel %vm185_vm2, %v918_v15, %v2791_v39  ;;  %v1692_v14 = vld [vmem:[%s3630_s1 + $0x7] ss:$0 sm:$0xff]  ;;  %v3863_v61 = vld [vmem:[#allocation26_spill] sm:$0xff] }
 0x227   : > { %v1186_v34 = vsel %vm181_vm0, %v2762_v56, %v1166_v41  ;;  %v614_v32 = vsel %vm191_vm5, %v613_v55, %v2557_v46  ;;  %v194_v16 = vsel %vm193_vm6, %v192_v51, %v2209_v11  ;;  %v463_v35 = vsel %vm193_vm6, %v462_v36, %v2427_v25  ;;  %v3855_v41 = vld [vmem:[#allocation91_spill] sm:$0xff]  ;;  %v3864_v15 = vld [vmem:[#allocation70_spill] sm:$0xff] }
 0x228   : > { %1508 = vrot.lane.b32.xlu1 %v2789_v19, %s3778_s25  ;;  %1505 = vrot.lane.b32.xlu0 %v2789_v19, %s3779_s4  ;;  %v1187_v27 = vsel %vm183_vm1, %v1186_v34, %v1169_v37  ;;  %v495_v39 = vsel %vm181_vm0, %v2437_v23, %v2435_v57  ;;  %v920_v46 = vsel %vm187_vm3, %v919_v22, %v2801_v52 }
 0x229   : > { %v228_v11 = vsel %vm183_vm1, %v227_v42, %v2217_v13  ;;  %v311_v25 = vsel %vm193_vm6, %v310_v40, %v2287_v30  ;;  %v496_v23 = vsel %vm183_vm1, %v495_v39, %v2445_v58  ;;  %v769_v52 = vsel %vm189_vm4, %v768_v31, %v2659_v43  ;;  %v1696_v13 = vld [vmem:[%s3630_s1 + $0xb] ss:$0 sm:$0xff]  ;;  %v3867_v31 = vld [vmem:[#allocation15_spill] sm:$0xff] }
 0x22a   : > { %v1175_v60 = vpop.permute.xlu1 %1174  ;;  %v1172_v63 = vpop.permute.xlu0 %1171  ;;  %v345_v38 = vsel %vm185_vm2, %v344_v1, %v3853_v12  ;;  %v615_v37 = vsel %vm193_vm6, %v614_v32, %v3854_v21  ;;  %v770_v30 = vsel %vm191_vm5, %v769_v52, %v3855_v41  ;;  %v469_v34 = vmul.f32 %v1692_v14, %v463_v35  ;;  %v3865_v40 = vld [vmem:[#allocation28_spill] sm:$0xff]  ;;  %v3868_v32 = vld [vmem:[#allocation30_spill] sm:$0xff]  ;;  %v3870_v35 = vld [vmem:[#allocation51_spill] sm:$0xff] }
 0x22b   : > { %v1188_v29 = vsel %vm185_vm2, %v1187_v27, %v1172_v63  ;;  %v346_v43 = vsel %vm187_vm3, %v345_v38, %v3856_v6  ;;  %v921_v24 = vsel %vm189_vm4, %v920_v46, %v3857_v3  ;;  %v3125_v27 = vmul.f32 %v1679_v45, %v194_v16  ;;  %v3875_v12 = vld [vmem:[#allocation95_spill] sm:$0xff]  ;;  %v3878_v6 = vld [vmem:[#allocation120_spill] sm:$0xff] }
 0x22c   : > { %1409 = vrot.lane.b32.xlu1 %v2700_v54, %s3775_s5  ;;  %1365 = vrot.lane.b32.xlu0 %v2789_v19, %s3743_s18  ;;  %v1189_v8 = vsel %vm187_vm3, %v1188_v29, %v1175_v60  ;;  %v317_v48 = vmul.f32 %v1688_v7, %v311_v25  ;;  %v497_v9 = vsel %vm185_vm2, %v496_v23, %v3858_v53  ;;  %v3860_v60 = vld [vmem:[#allocation49_spill] sm:$0xff]  ;;  %v1689_v3 = vld [vmem:[%s3630_s1 + $0x4] ss:$0 sm:$0xff] }
 0x22d   : > { %v922_v59 = vsel %vm191_vm5, %v921_v24, %v3859_v50  ;;  %v498_v63 = vsel %vm187_vm3, %v497_v9, %v3860_v60  ;;  %v621_v51 = vmul.f32 %v1696_v13, %v615_v37  ;;  %v771_v29 = vsel %vm193_vm6, %v770_v30, %v3861_v62  ;;  %v1716_v25 = vld [vmem:[%s3630_s1 + $0x17] ss:$0 sm:$0xff]  ;;  %v3877_v30 = vld [vmem:[#allocation119_spill] sm:$0xff]  ;;  %v3881_v50 = vld [vmem:[#allocation122_spill] sm:$0xff] }
 0x22e   : > { %v1181_v28 = vpop.permute.xlu1 %1180  ;;  %v1178_v0 = vpop.permute.xlu0 %1177  ;;  %v229_v42 = vsel %vm185_vm2, %v228_v11, %v3862_v17  ;;  %v347_v49 = vsel %vm189_vm4, %v346_v43, %v3863_v61  ;;  %v648_v20 = vsel %vm181_vm0, %v3865_v40, %v3864_v15  ;;  %v470_v10 = vadd.f32 %v469_v34, %v317_v48  ;;  %v3873_v11 = vld [vmem:[#allocation93_spill] sm:$0xff]  ;;  %v3879_v24 = vld [vmem:[#allocation31_spill] sm:$0xff]  ;;  %v3880_v48 = vld [vmem:[#allocation32_spill] sm:$0xff] }
 0x22f   : > { %v1190_v5 = vsel %vm189_vm4, %v1189_v8, %v1178_v0  ;;  %v3866_v0 = vld [vmem:[#allocation117_spill] sm:$0xff]  ;;  %v348_v22 = vsel %vm191_vm5, %v347_v49, %v3868_v32  ;;  %v777_v14 = vmul.f32 %v1708_v26, %v771_v29  ;;  %v955_v43 = vsel %vm181_vm0, %v3878_v6, %v3877_v30  ;;  %v3882_v60 = vld [vmem:[#allocation143_spill] sm:$0xff]  ;;  %v3884_v62 = vld [vmem:[#allocation50_spill] sm:$0xff] }
 0x230   : > { %1479 = vrot.lane.b32.xlu1 %v2762_v56, %s3771_s30  ;;  %1447 = vrot.lane.b32.xlu0 %v2727_v47, %s3775_s5  ;;  %v1191_v33 = vsel %vm191_vm5, %v1190_v5, %v1181_v28  ;;  %v1712_v28 = vld [vmem:[%s3630_s1 + $0x13] ss:$0 sm:$0xff]  ;;  %v923_v1 = vsel %vm193_vm6, %v922_v59, %v3866_v0  ;;  %v230_v5 = vsel %vm187_vm3, %v229_v42, %v3867_v31  ;;  %v1728_v61 = vld [vmem:[%s3630_s1 + $0x1b] ss:$0 sm:$0xff] }
 0x231   : > { %v622_v46 = vadd.f32 %v621_v51, %v470_v10  ;;  %v929_v13 = vmul.f32 %v1712_v28, %v923_v1  ;;  %v3876_v37 = vld [vmem:[#allocation29_spill] sm:$0xff]  ;;  %v381_v53 = vsel %vm181_vm0, %v3880_v48, %v3879_v24  ;;  %v956_v59 = vsel %vm183_vm1, %v955_v43, %v3881_v50  ;;  %v3883_v51 = vld [vmem:[#allocation34_spill] sm:$0xff]  ;;  %v1693_v15 = vld [vmem:[%s3630_s1 + $0x8] ss:$0 sm:$0xff] }
 0x232   : > { %v1205_v57 = vpop.permute.xlu1 %1204  ;;  %v1184_v4 = vpop.permute.xlu0 %1183  ;;  %v349_v41 = vsel %vm193_vm6, %v348_v22, %v3876_v37  ;;  %v382_v26 = vsel %vm183_vm1, %v381_v53, %v3883_v51  ;;  %v3887_v40 = vld [vmem:[#allocation74_spill] sm:$0xff]  ;;  %v3890_v22 = vld [vmem:[#allocation33_spill] sm:$0xff]  ;;  %v3902_v50 = vld [vmem:[#allocation35_spill] sm:$0xff] }
 0x233   : > { %v3115_v58 = vsel %vm193_vm6, %v1191_v33, %v1184_v4  ;;  %v1225_v2 = vsel %vm181_vm0, %v2789_v19, %v1205_v57  ;;  %v3869_v33 = vld [vmem:[#allocation48_spill] sm:$0xff]  ;;  %v778_v9 = vadd.f32 %v777_v14, %v622_v46  ;;  %v355_v1 = vmul.f32 %v1689_v3, %v349_v41  ;;  %v3897_v41 = vld [vmem:[#allocation123_spill] sm:$0xff]  ;;  %v3898_v6 = vld [vmem:[#allocation14_spill] sm:$0xff] }
 0x234   : > { %1368 = vrot.lane.b32.xlu1 %v2789_v19, %s3742_s21  ;;  %1511 = vrot.lane.b32.xlu0 %v2789_v19, %s3783_s20  ;;  %v499_v16 = vsel %vm189_vm4, %v498_v63, %v3869_v33  ;;  %v3874_v57 = vld [vmem:[#allocation72_spill] sm:$0xff]  ;;  %v1081_v63 = vmul.f32 %v1716_v25, %v3882_v60  ;;  %v383_v33 = vsel %vm185_vm2, %v382_v26, %v3890_v22  ;;  %v3900_v24 = vld [vmem:[#allocation53_spill] sm:$0xff]  ;;  %v3901_v53 = vld [vmem:[#allocation126_spill] sm:$0xff] }
 0x235   : > { %v500_v39 = vsel %vm191_vm5, %v499_v16, %v3870_v35  ;;  %v930_v28 = vadd.f32 %v929_v13, %v778_v9  ;;  %v3891_v16 = vld [vmem:[#allocation124_spill] sm:$0xff]  ;;  %v231_v43 = vsel %vm189_vm4, %v230_v5, %v3898_v6  ;;  %v3903_v60 = vld [vmem:[#allocation55_spill] sm:$0xff]  ;;  %v1709_v5 = vld [vmem:[%s3630_s1 + $0x10] ss:$0 sm:$0xff] }
 0x236   : > { %v1211_v18 = vpop.permute.xlu1 %1210  ;;  %v1208_v8 = vpop.permute.xlu0 %1207  ;;  %v501_v29 = vsel %vm193_vm6, %v500_v39, %v3884_v62  ;;  %v3892_v46 = vld [vmem:[#allocation36_spill] sm:$0xff]  ;;  %v3904_v26 = vld [vmem:[#allocation98_spill] sm:$0xff]  ;;  %v3911_v22 = vld [vmem:[#allocation37_spill] sm:$0xff] }
 0x237   : > { %v1226_v36 = vsel %vm183_vm1, %v1225_v2, %v1208_v8  ;;  %v3885_v2 = vld [vmem:[#allocation71_spill] sm:$0xff]  ;;  %v3886_v8 = vld [vmem:[#allocation94_spill] sm:$0xff]  ;;  %v1082_v35 = vadd.f32 %v1081_v63, %v930_v28  ;;  %v3899_v3 = vld [vmem:[#allocation52_spill] sm:$0xff] }
 0x238   : > { %1450 = vrot.lane.b32.xlu1 %v2727_v47, %s3774_s3  ;;  %1412 = vrot.lane.b32.xlu0 %v2700_v54, %s3774_s3  ;;  %v1227_v55 = vsel %vm185_vm2, %v1226_v36, %v1211_v18  ;;  %v3871_v47 = vld [vmem:[#allocation69_spill] sm:$0xff]  ;;  %v3872_v54 = vld [vmem:[#allocation92_spill] sm:$0xff]  ;;  %v533_v48 = vsel %vm181_vm0, %v3900_v24, %v3899_v3  ;;  %v3921_v3 = vld [vmem:[#allocation130_spill] sm:$0xff] }
 0x239   : > { %v649_v45 = vsel %vm183_vm1, %v648_v20, %v3871_v47  ;;  %v803_v7 = vsel %vm181_vm0, %v3873_v11, %v3872_v54  ;;  %v3888_v36 = vld [vmem:[#allocation97_spill] sm:$0xff]  ;;  %v384_v47 = vsel %vm187_vm3, %v383_v33, %v3892_v46  ;;  %v534_v63 = vsel %vm183_vm1, %v533_v48, %v3903_v60  ;;  %v3920_v6 = vld [vmem:[#allocation56_spill] sm:$0xff]  ;;  %v3924_v60 = vld [vmem:[#allocation59_spill] sm:$0xff] }
 0x23a   : > { %v1217_v23 = vpop.permute.xlu1 %1216  ;;  %v1214_v52 = vpop.permute.xlu0 %1213  ;;  %v650_v4 = vsel %vm185_vm2, %v649_v45, %v3874_v57  ;;  %v804_v38 = vsel %vm183_vm1, %v803_v7, %v3875_v12  ;;  %v507_v45 = vmul.f32 %v1693_v15, %v501_v29  ;;  %v3893_v54 = vld [vmem:[#allocation73_spill] sm:$0xff]  ;;  %v3894_v7 = vld [vmem:[#allocation96_spill] sm:$0xff]  ;;  %v3907_v15 = vld [vmem:[#allocation78_spill] sm:$0xff] }
 0x23b   : > { %v1228_v21 = vsel %vm187_vm3, %v1227_v55, %v1214_v52  ;;  %v651_v18 = vsel %vm187_vm3, %v650_v4, %v3885_v2  ;;  %v805_v17 = vsel %vm185_vm2, %v804_v38, %v3886_v8  ;;  %v3889_v55 = vld [vmem:[#allocation121_spill] sm:$0xff]  ;;  %v1699_v57 = vld [vmem:[%s3630_s1 + $0xc] ss:$0 sm:$0xff]  ;;  %v3896_v38 = vld [vmem:[#allocation99_spill] sm:$0xff] }
 0x23c   : > { %1514 = vrot.lane.b32.xlu1 %v2789_v19, %s3782_s0  ;;  %1482 = vrot.lane.b32.xlu0 %v2762_v56, %s3786_s19  ;;  %v1229_v34 = vsel %vm189_vm4, %v1228_v21, %v1217_v23  ;;  %v652_v20 = vsel %vm189_vm4, %v651_v18, %v3887_v40  ;;  %v806_v10 = vsel %vm187_vm3, %v805_v17, %v3888_v36  ;;  %v3895_v4 = vld [vmem:[#allocation76_spill] sm:$0xff]  ;;  %v3905_v2 = vld [vmem:[#allocation38_spill] sm:$0xff]  ;;  %v3906_v17 = vld [vmem:[#allocation75_spill] sm:$0xff] }
 0x23d   : > { %v957_v31 = vsel %vm185_vm2, %v956_v59, %v3889_v55  ;;  %v653_v11 = vsel %vm191_vm5, %v652_v20, %v3893_v54  ;;  %v807_v25 = vsel %vm189_vm4, %v806_v10, %v3894_v7  ;;  %v385_v59 = vsel %vm189_vm4, %v384_v47, %v3902_v50  ;;  %v1838_v8 = vld [vmem:[%s2053_s6 + $0x19] sm:$0xff]  ;;  %v1713_v20 = vld [vmem:[%s3630_s1 + $0x14] ss:$0 sm:$0xff]  ;;  %v1719_v47 = vld [vmem:[%s3630_s1 + $0x18] ss:$0 sm:$0xff] }
 0x23e   : > { %v1223_v42 = vpop.permute.xlu1 %1222  ;;  %v1220_v49 = vpop.permute.xlu0 %1219  ;;  %v958_v14 = vsel %vm187_vm3, %v957_v31, %v3891_v16  ;;  %v654_v12 = vsel %vm193_vm6, %v653_v11, %v3895_v4  ;;  %v808_v13 = vsel %vm191_vm5, %v807_v25, %v3896_v38  ;;  %v386_v18 = vsel %vm191_vm5, %v385_v59, %v3905_v2  ;;  %v3908_v36 = vld [vmem:[#allocation125_spill] sm:$0xff]  ;;  %v3910_v55 = vld [vmem:[#allocation54_spill] sm:$0xff]  ;;  %v1690_v11 = vld [vmem:[%s3630_s1 + $0x5] ss:$0 sm:$0xff] }
 0x23f   : > { %v1230_v0 = vsel %vm191_vm5, %v1229_v34, %v1220_v49  ;;  %v959_v30 = vsel %vm189_vm4, %v958_v14, %v3897_v41  ;;  %v356_v34 = vadd.f32 %v355_v1, %v3125_v27  ;;  %v660_v51 = vmul.f32 %v1699_v57, %v654_v12  ;;  %v3912_v16 = vld [vmem:[#allocation57_spill] sm:$0xff]  ;;  %v3917_v12 = vld [vmem:[#allocation80_spill] sm:$0xff] }
 0x240   : > { %v1231_v32 = vsel %vm193_vm6, %v1230_v0, %v1223_v42  ;;  %1485 = vrot.lane.b32.xlu1 %v2762_v56, %s3775_s5  ;;  %1371 = vrot.lane.b32.xlu0 %v2789_v19, %s3747_s29  ;;  %v960_v9 = vsel %vm191_vm5, %v959_v30, %v3901_v53  ;;  %v809_v27 = vsel %vm193_vm6, %v808_v13, %v3904_v26  ;;  %v3909_v0 = vld [vmem:[#allocation17_spill] sm:$0xff]  ;;  %v3918_v13 = vld [vmem:[#allocation127_spill] sm:$0xff]  ;;  %v3922_v48 = vld [vmem:[#allocation144_spill] sm:$0xff] }
 0x241   : > { %v1237_v39 = vmul.f32 %v1728_v61, %v1231_v32  ;;  %v687_v42 = vsel %vm181_vm0, %v1838_v8, %v3906_v17  ;;  %v508_v61 = vadd.f32 %v507_v45, %v356_v34  ;;  %v961_v10 = vsel %vm193_vm6, %v960_v9, %v3908_v36  ;;  %v3914_v46 = vld [vmem:[#allocation101_spill] sm:$0xff]  ;;  %v3923_v9 = vld [vmem:[#allocation16_spill] sm:$0xff]  ;;  %v1729_v26 = vld [vmem:[%s3630_s1 + $0x1c] ss:$0 sm:$0xff] }
 0x242   : > { %v1243_v23 = vpop.permute.xlu1 %1242  ;;  %v1240_v52 = vpop.permute.xlu0 %1239  ;;  %v688_v40 = vsel %vm183_vm1, %v687_v42, %v3907_v15  ;;  %v232_v1 = vsel %vm191_vm5, %v231_v43, %v3909_v0  ;;  %v535_v31 = vsel %vm185_vm2, %v534_v63, %v3910_v55  ;;  %v815_v32 = vmul.f32 %v1709_v5, %v809_v27  ;;  %v3915_v7 = vld [vmem:[#allocation77_spill] sm:$0xff]  ;;  %v1694_v0 = vld [vmem:[%s3630_s1 + $0x9] ss:$0 sm:$0xff] }
 0x243   : > { %v1263_v21 = vsel %vm181_vm0, %v1240_v52, %v1243_v23  ;;  %v3242_v37 = vadd.f32 %v1237_v39, %v1082_v35  ;;  %v387_v33 = vsel %vm193_vm6, %v386_v18, %v3911_v22  ;;  %v536_v14 = vsel %vm187_vm3, %v535_v31, %v3912_v16  ;;  %v3913_v39 = vld [vmem:[#allocation100_spill] sm:$0xff]  ;;  %v3916_v23 = vld [vmem:[#allocation103_spill] sm:$0xff]  ;;  %v3927_v18 = vld [vmem:[#allocation105_spill] sm:$0xff] }
 0x244   : > { %1374 = vrot.lane.b32.xlu1 %v2789_v19, %s3746_s28  ;;  %1517 = vrot.lane.b32.xlu0 %v2789_v19, %s3771_s30  ;;  %v661_v35 = vadd.f32 %v660_v51, %v508_v61  ;;  %v689_v25 = vsel %vm185_vm2, %v688_v40, %v3915_v7  ;;  %v967_v57 = vmul.f32 %v1713_v20, %v961_v10  ;;  %v3925_v51 = vld [vmem:[#allocation102_spill] sm:$0xff]  ;;  %v3928_v61 = vld [vmem:[#allocation39_spill] sm:$0xff]  ;;  %v3931_v36 = vld [vmem:[#allocation129_spill] sm:$0xff]  ;;  %s148_s28 = sand.u32 1, %s1911_s10  }
 0x245   : > { %v690_v38 = vsel %vm187_vm3, %v689_v25, %v3917_v12  ;;  %v537_v43 = vsel %vm189_vm4, %v536_v14, %v3920_v6  ;;  %v1120_v53 = vmul.f32 %v1719_v47, %v3922_v48  ;;  %v233_v50 = vsel %vm193_vm6, %v232_v1, %v3923_v9  ;;  %v3930_v40 = vld [vmem:[#allocation82_spill] sm:$0xff]  ;;  %v3933_v31 = vld [vmem:[#allocation132_spill] sm:$0xff]  ;;  %v3937_v7 = vld [vmem:[#allocation107_spill] sm:$0xff]  ;;  %s1676_s27 = sshll.u32 %s148_s28, 3 }
 0x246   : > { %v1249_v62 = vpop.permute.xlu1 %1248  ;;  %v1246_v29 = vpop.permute.xlu0 %1245  ;;  %v816_v34 = vadd.f32 %v815_v32, %v661_v35  ;;  %v393_v59 = vmul.f32 %v1690_v11, %v387_v33  ;;  %v538_v63 = vsel %vm191_vm5, %v537_v43, %v3924_v60  ;;  %v3932_v1 = vld [vmem:[#allocation58_spill] sm:$0xff]  ;;  %v3941_v43 = vld [vmem:[#allocation60_spill] sm:$0xff]  ;;  %s150_s17 = scalar_lea.vmem [#allocation2], %s1676_s27 }
 0x247   : > { %v1264_v49 = vsel %vm183_vm1, %v1263_v21, %v1246_v29  ;;  %v3919_v21 = vld [vmem:[#allocation128_spill] sm:$0xff]  ;;  %v3926_v29 = vld [vmem:[#allocation79_spill] sm:$0xff]  ;;  %v539_v55 = vsel %vm193_vm6, %v538_v63, %v3932_v1  ;;  %v3934_v14 = vld [vmem:[#allocation42_spill] sm:$0xff] }
 0x248   : > { %1520 = vrot.lane.b32.xlu1 %v2789_v19, %s3786_s19  ;;  %1488 = vrot.lane.b32.xlu0 %v2762_v56, %s3774_s3  ;;  %v1265_v28 = vsel %vm185_vm2, %v1264_v49, %v1249_v62  ;;  %v841_v56 = vsel %vm181_vm0, %v3914_v46, %v3913_v39  ;;  %v993_v41 = vsel %vm181_vm0, %v3919_v21, %v3918_v13  ;;  %v1682_v62 = vld [vmem:[%s3630_s1 + $0x1] ss:$0 sm:$0xff]  ;;  %v3929_v49 = vld [vmem:[#allocation40_spill] sm:$0xff]  ;;  %s1738_s19 = sshll.u32 %s1923_s13, 1  ;;  %s1549_s13 = scalar_lea.sflag [#allocation3], %s148_s28 }
 0x249   : > { %v842_v52 = vsel %vm183_vm1, %v841_v56, %v3916_v23  ;;  %v994_v24 = vsel %vm183_vm1, %v993_v41, %v3921_v3  ;;  %v691_v2 = vsel %vm189_vm4, %v690_v38, %v3926_v29  ;;  %v968_v17 = vadd.f32 %v967_v57, %v816_v34  ;;  %v3935_v39 = vld [vmem:[#allocation104_spill] sm:$0xff]  ;;  %v1839_v57 = vld [vmem:[%s2053_s6 + $0x30] sm:$0xff]  ;;  %v3939_v13 = vld [vmem:[#allocation131_spill] sm:$0xff]  ;;  %s1560_s7 = sadd.s32 %s1919_s12, %s1738_s19  ;;  %s1960_s12 = smov [#allocation2]  }
 0x24a   : > { %v1255_v45 = vpop.permute.xlu1 %1254  ;;  %v1252_v54 = vpop.permute.xlu0 %1251  ;;  %v419_v15 = vsel %vm181_vm0, %v3929_v49, %v3928_v61  ;;  %v692_v20 = vsel %vm191_vm5, %v691_v2, %v3930_v40  ;;  %v995_v10 = vsel %vm185_vm2, %v994_v24, %v3931_v36  ;;  %v239_v16 = vmul.f32 %v1682_v62, %v233_v50  ;;  %v3942_v34 = vld [vmem:[#allocation61_spill] sm:$0xff]  ;;  %v3943_v24 = vld [vmem:[#allocation134_spill] sm:$0xff]  ;;  %v3945_v50 = vld [vmem:[#allocation63_spill] sm:$0xff]  ;;  %s1739_s8 = sshll.u32 %s1560_s7, 7  ;;  %s1845_s24 = sshll.u32 %s1960_s12, 4  ;;  %s1846_s24 = int_to_ptr.vmem [resolvable:$false] %s1845_s24 }
 0x24b   : > { %v1266_v4 = vsel %vm187_vm3, %v1265_v28, %v1252_v54  ;;  %v996_v32 = vsel %vm187_vm3, %v995_v10, %v3933_v31  ;;  %v1121_v22 = vadd.f32 %v1120_v53, %v968_v17  ;;  %v420_v35 = vsel %vm183_vm1, %v419_v15, %v3934_v14  ;;  %v3936_v54 = vld [vmem:[#allocation81_spill] sm:$0xff]  ;;  %v3944_v53 = vld [vmem:[#allocation44_spill] sm:$0xff]  ;;  %v3951_v36 = vld [vmem:[#allocation43_spill] sm:$0xff]  ;;  %s3576_s20 = scalar_lea.hbm %s3631_s2, %s1739_s8  ;;  %s1847_s25 = scalar_lea.vmem %s1846_s24, 256 }
 0x24c   : > { %1523 = vrot.lane.b32.xlu0 %v2789_v19, %s3775_s5  ;;  %1526 = vrot.lane.b32.xlu1 %v2789_v19, %s3774_s3  ;;  %v1267_v30 = vsel %vm189_vm4, %v1266_v4, %v1255_v45  ;;  %v843_v19 = vsel %vm185_vm2, %v842_v52, %v3925_v51  ;;  %v1702_v45 = vld [vmem:[%s3630_s1 + $0xd] ss:$0 sm:$0xff]  ;;  %v693_v11 = vsel %vm193_vm6, %v692_v20, %v3936_v54  ;;  %v3938_v4 = vld [vmem:[#allocation19_spill] sm:$0xff]  ;;  %v3946_v51 = vld [vmem:[#allocation106_spill] sm:$0xff]  ;;  %s1564_s3 = sshll.u32 %s150_s17, 4  ;;  %s3578_s3 = int_to_ptr.vmem [resolvable:$true] %s1564_s3 }
 0x24d   : > { %v844_v8 = vsel %vm187_vm3, %v843_v19, %v3927_v18  ;;  %v266_v12 = vsel %vm181_vm0, %v1839_v57, %v3938_v4  ;;  %v545_v38 = vmul.f32 %v1694_v0, %v539_v55  ;;  %v997_v21 = vsel %vm189_vm4, %v996_v32, %v3939_v13  ;;  %v1840_v18 = vld [vmem:[%s2053_s6 + $0x31] sm:$0xff]  ;;  %v3958_v54 = vld [vmem:[#allocation111_spill] sm:$0xff]  ;;  %v3962_v13 = vld [vmem:[#allocation136_spill] sm:$0xff]  ;;  %s1841_s21 = scalar_lea.vmem %s3578_s3, 128  ;;  %p1848_p2 = scmp.lt.s32.totalorder %s3578_s3, %s1846_s24 }
 0x24e   : > { %v1261_v5 = vpop.permute.xlu1 %1260  ;;  %v1258_v27 = vpop.permute.xlu0 %1257  ;;  %v845_v46 = vsel %vm189_vm4, %v844_v8, %v3935_v39  ;;  %v394_v41 = vadd.f32 %v393_v59, %v239_v16  ;;  %v571_v3 = vsel %vm181_vm0, %v3942_v34, %v3941_v43  ;;  %v998_v48 = vsel %vm191_vm5, %v997_v21, %v3943_v24  ;;  %v1710_v59 = vld [vmem:[%s3630_s1 + $0x11] ss:$0 sm:$0xff]  ;;  %v3948_v8 = vld [vmem:[#allocation84_spill] sm:$0xff]  ;;  %v3953_v55 = vld [vmem:[#allocation46_spill] sm:$0xff]  ;;  %p1842_p13 = scmp.ne.s32.totalorder %s3578_s3, %s1841_s21  ;;  %p1849_p4 = scmp.lt.s32.totalorder %s1847_s25, %s1841_s21 }
 0x24f   : > { %v1268_v42 = vsel %vm191_vm5, %v1267_v30, %v1258_v27  ;;  %v846_v25 = vsel %vm191_vm5, %v845_v46, %v3937_v7  ;;  %v3940_v30 = vld [vmem:[#allocation41_spill] sm:$0xff]  ;;  %v572_v60 = vsel %vm183_vm1, %v571_v3, %v3945_v50  ;;  %v699_v63 = vmul.f32 %v1702_v45, %v693_v11  ;;  %v3947_v27 = vld [vmem:[#allocation18_spill] sm:$0xff]  ;;  %v3955_v16 = vld [vmem:[#allocation108_spill] sm:$0xff] }
 0x250   : > { %v1269_v28 = vsel %vm193_vm6, %v1268_v42, %v1261_v5  ;;  %v421_v6 = vsel %vm185_vm2, %v420_v35, %v3940_v30  ;;  %v847_v19 = vsel %vm193_vm6, %v846_v25, %v3946_v51  ;;  %v267_v62 = vsel %vm183_vm1, %v266_v12, %v3947_v27  ;;  %v1714_v42 = vld [vmem:[%s3630_s1 + $0x15] ss:$0 sm:$0xff]  ;;  %v1722_v39 = vld [vmem:[%s3630_s1 + $0x19] ss:$0 sm:$0xff]  ;;  %v3963_v30 = vld [vmem:[#allocation64_spill] sm:$0xff]  ;;  %p1843_p0 = pnand %p1842_p13, %p2027_p3  ;;  %p1850_p5 = por %p1849_p4, %p1848_p2 }
 0x251   : > { %v1275_v33 = vmul.f32 %v1729_v26, %v1269_v28  ;;  %v422_v9 = vsel %vm187_vm3, %v421_v6, %v3944_v53  ;;  %v546_v2 = vadd.f32 %v545_v38, %v394_v41  ;;  %v726_v17 = vsel %vm181_vm0, %v1840_v18, %v3948_v8  ;;  %v3949_v61 = vld [vmem:[#allocation133_spill] sm:$0xff]  ;;  %v3952_v28 = vld [vmem:[#allocation62_spill] sm:$0xff]  ;;  %v3961_v38 = vld [vmem:[#allocation135_spill] sm:$0xff] }
 0x252   : > { %v1281_v56 = vpop.permute.xlu1 %1280  ;;  %v1278_v47 = vpop.permute.xlu0 %1277  ;;  %v999_v49 = vsel %vm193_vm6, %v998_v48, %v3949_v61  ;;  %v3950_v40 = vld [vmem:[#allocation21_spill] sm:$0xff]  ;;  %v423_v10 = vsel %vm189_vm4, %v422_v9, %v3951_v36  ;;  %v573_v0 = vsel %vm185_vm2, %v572_v60, %v3952_v28  ;;  %v853_v1 = vmul.f32 %v1710_v59, %v847_v19  ;;  %v3960_v4 = vld [vmem:[#allocation86_spill] sm:$0xff]  ;;  %v3965_v48 = vld [vmem:[#allocation23_spill] sm:$0xff]  ;;  %p1844_p1 = pneg %p1843_p0 }
 0x253   : > { %v1301_v23 = vsel %vm181_vm0, %v1278_v47, %v1281_v56  ;;  %v3366_v52 = vadd.f32 %v1275_v33, %v1121_v22  ;;  %v268_v20 = vsel %vm185_vm2, %v267_v62, %v3950_v40  ;;  %v424_v31 = vsel %vm191_vm5, %v423_v10, %v3953_v55  ;;  %v3954_v32 = vld [vmem:[#allocation65_spill] sm:$0xff]  ;;  %v3957_v47 = vld [vmem:[#allocation83_spill] sm:$0xff]  ;;  %v3964_v34 = vld [vmem:[#allocation138_spill] sm:$0xff] }
 0x254   : > { %v574_v22 = vsel %vm187_vm3, %v573_v0, %v3954_v32  ;;  %v700_v33 = vadd.f32 %v699_v63, %v546_v2  ;;  %v3956_v14 = vld [vmem:[#allocation109_spill] sm:$0xff]  ;;  %v727_v45 = vsel %vm183_vm1, %v726_v17, %v3957_v47  ;;  %v1005_v7 = vmul.f32 %v1714_v42, %v999_v49  ;;  %v3967_v60 = vld [vmem:[#allocation67_spill] sm:$0xff]  ;;  %v3968_v59 = vld [vmem:[#allocation110_spill] sm:$0xff]  ;;  %p1851_p6 = pnand %p1850_p5, %p1844_p1 }
 0x255   : > { %v879_v35 = vsel %vm181_vm0, %v3956_v14, %v3955_v16  ;;  %v728_v12 = vsel %vm185_vm2, %v727_v45, %v3960_v4  ;;  %v1031_v21 = vsel %vm181_vm0, %v3962_v13, %v3961_v38  ;;  %v575_v6 = vsel %vm189_vm4, %v574_v22, %v3963_v30  ;;  %v3966_v9 = vld [vmem:[#allocation45_spill] sm:$0xff]  ;;  %v3971_v17 = vld [vmem:[#allocation88_spill] sm:$0xff]  ;;  %v3973_v40 = vld [vmem:[#allocation22_spill] sm:$0xff] }
 0x256   : > { %v1287_v5 = vpop.permute.xlu1 %1286  ;;  %v1284_v26 = vpop.permute.xlu0 %1283  ;;  %v880_v11 = vsel %vm183_vm1, %v879_v35, %v3958_v54  ;;  %v854_v43 = vadd.f32 %v853_v1, %v700_v33  ;;  %v1032_v3 = vsel %vm183_vm1, %v1031_v21, %v3964_v34  ;;  %v1159_v24 = vmul.f32 %v1722_v39, %v2985_v44  ;;  %v1691_v44 = vld [vmem:[%s3630_s1 + $0x6] ss:$0 sm:$0xff]  ;;  %v3969_v27 = vld [vmem:[#allocation85_spill] sm:$0xff]  ;;  %v3974_v36 = vld [vmem:[#allocation140_spill] sm:$0xff] }
 0x257   : > { %v1302_v29 = vsel %vm183_vm1, %v1301_v23, %v1284_v26  ;;  %v3959_v23 = vld [vmem:[#allocation20_spill] sm:$0xff]  ;;  %v425_v50 = vsel %vm193_vm6, %v424_v31, %v3966_v9  ;;  %v576_v63 = vsel %vm191_vm5, %v575_v6, %v3967_v60  ;;  %v881_v51 = vsel %vm185_vm2, %v880_v11, %v3968_v59  ;;  %v3972_v61 = vld [vmem:[#allocation137_spill] sm:$0xff]  ;;  %v1685_v1 = vld [vmem:[%s3630_s1 + $0x2] ss:$0 sm:$0xff] }
 0x258   : > { %v1303_v15 = vsel %vm185_vm2, %v1302_v29, %v1287_v5  ;;  %v269_v57 = vsel %vm187_vm3, %v268_v20, %v3959_v23  ;;  %v1730_v5 = vld [vmem:[%s3630_s1 + $0x1d] ss:$0 sm:$0xff]  ;;  %v729_v62 = vsel %vm187_vm3, %v728_v12, %v3969_v27  ;;  %v3970_v29 = vld [vmem:[#allocation113_spill] sm:$0xff]  ;;  %v1006_v18 = vadd.f32 %v1005_v7, %v854_v43  ;;  %v3975_v55 = vld [vmem:[#allocation24_spill] sm:$0xff] }
 0x259   : > { %v270_v53 = vsel %vm189_vm4, %v269_v57, %v3965_v48  ;;  %v882_v2 = vsel %vm187_vm3, %v881_v51, %v3970_v29  ;;  %v730_v42 = vsel %vm189_vm4, %v729_v62, %v3971_v17  ;;  %v1033_v49 = vsel %vm185_vm2, %v1032_v3, %v3972_v61  ;;  %v1695_v22 = vld [vmem:[%s3630_s1 + $0xa] ss:$0 sm:$0xff]  ;;  %v3976_v33 = vld [vmem:[#allocation66_spill] sm:$0xff]  ;;  %v3979_v45 = vld [vmem:[#allocation115_spill] sm:$0xff] }
 0x25a   : > { %v1293_v46 = vpop.permute.xlu1 %1292  ;;  %v1290_v56 = vpop.permute.xlu0 %1289  ;;  %v271_v20 = vsel %vm191_vm5, %v270_v53, %v3973_v40  ;;  %v1034_v10 = vsel %vm187_vm3, %v1033_v49, %v3974_v36  ;;  %v1160_v28 = vadd.f32 %v1159_v24, %v1006_v18  ;;  %v431_v32 = vmul.f32 %v1691_v44, %v425_v50  ;;  %v3977_v14 = vld [vmem:[#allocation112_spill] sm:$0xff]  ;;  %v3980_v23 = vld [vmem:[#allocation89_spill] sm:$0xff]  ;;  %v3981_v4 = vld [vmem:[#allocation139_spill] sm:$0xff] }
 0x25b   : > { %v1304_v25 = vsel %vm187_vm3, %v1303_v15, %v1290_v56  ;;  %v272_v31 = vsel %vm193_vm6, %v271_v20, %v3975_v55  ;;  %v577_v16 = vsel %vm193_vm6, %v576_v63, %v3976_v33  ;;  %v883_v35 = vsel %vm189_vm4, %v882_v2, %v3977_v14  ;;  %v3978_v56 = vld [vmem:[#allocation87_spill] sm:$0xff]  ;;  %v3982_v21 = vld [vmem:[#allocation142_spill] sm:$0xff]  ;;  %v1711_v30 = vld [vmem:[%s3630_s1 + $0x12] ss:$0 sm:$0xff] }
 0x25c   : > { %v1305_v41 = vsel %vm189_vm4, %v1304_v25, %v1293_v46  ;;  %v731_v47 = vsel %vm191_vm5, %v730_v42, %v3978_v56  ;;  %v884_v54 = vsel %vm191_vm5, %v883_v35, %v3979_v45  ;;  %v1705_v25 = vld [vmem:[%s3630_s1 + $0xe] ss:$0 sm:$0xff]  ;;  %v1035_v12 = vsel %vm189_vm4, %v1034_v10, %v3981_v4  ;;  %v3983_v6 = vld [vmem:[#allocation114_spill] sm:$0xff]  ;;  %v1715_v9 = vld [vmem:[%s3630_s1 + $0x16] ss:$0 sm:$0xff] }
 0x25d   : > { %v732_v57 = vsel %vm193_vm6, %v731_v47, %v3980_v23  ;;  %v278_v38 = vmul.f32 %v1685_v1, %v272_v31  ;;  %v583_v13 = vmul.f32 %v1695_v22, %v577_v16  ;;  %v885_v43 = vsel %vm193_vm6, %v884_v54, %v3983_v6  ;;  %v3984_v50 = vld [vmem:[#allocation141_spill] sm:$0xff]  ;;  %v1731_v17 = vld [vmem:[%s3630_s1 + $0x1e] ss:$0 sm:$0xff] }
 0x25e   : > { %v1299_v19 = vpop.permute.xlu1 %1298  ;;  %v1296_v26 = vpop.permute.xlu0 %1295  ;;  %v738_v48 = vmul.f32 %v1705_v25, %v732_v57  ;;  %v891_v51 = vmul.f32 %v1711_v30, %v885_v43 }
 0x25f   : > { %v1306_v8 = vsel %vm191_vm5, %v1305_v41, %v1296_v26  ;;  %v1036_v41 = vsel %vm191_vm5, %v1035_v12, %v3982_v21  ;;  %v432_v24 = vadd.f32 %v431_v32, %v278_v38 }
 0x260   : > { %v1307_v15 = vsel %vm193_vm6, %v1306_v8, %v1299_v19  ;;  %v1037_v60 = vsel %vm193_vm6, %v1036_v41, %v3984_v50  ;;  %v1725_v19 = vld [vmem:[%s3630_s1 + $0x1a] ss:$0 sm:$0xff]  ;;  %v1734_v50 = vld [vmem:[%s3630_s1 + $0x21] ss:$0 sm:$0xff] }
 0x261   : > { %v1313_v0 = vmul.f32 %v1730_v5, %v1307_v15  ;;  %v584_v59 = vadd.f32 %v583_v13, %v432_v24  ;;  %v1043_v27 = vmul.f32 %v1715_v9, %v1037_v60  ;;  %v1198_v18 = vmul.f32 %v1725_v19, %v3115_v58  ;;  %v1733_v60 = vld [vmem:[%s3630_s1 + $0x20] ss:$0 sm:$0xff] }
 0x262   : > { %v1319_v39 = vpop.permute.xlu1 %1318  ;;  %v1316_v46 = vpop.permute.xlu0 %1315 }
 0x263   : > { %v1339_v11 = vsel %vm181_vm0, %v1316_v46, %v1319_v39  ;;  %v3480_v7 = vadd.f32 %v1313_v0, %v1160_v28  ;;  %v739_v44 = vadd.f32 %v738_v48, %v584_v59 }
 0x265   : > { %v892_v2 = vadd.f32 %v891_v51, %v739_v44 }
 0x266   : > { %v1325_v34 = vpop.permute.xlu1 %1324  ;;  %v1322_v3 = vpop.permute.xlu0 %1321 }
 0x267   : > { %v1340_v53 = vsel %vm183_vm1, %v1339_v11, %v1322_v3  ;;  %v1044_v61 = vadd.f32 %v1043_v27, %v892_v2 }
 0x268   : > { %v1341_v63 = vsel %vm185_vm2, %v1340_v53, %v1325_v34 }
 0x269   : > { %v1199_v40 = vadd.f32 %v1198_v18, %v1044_v61 }
 0x26a   : > { %v1331_v5 = vpop.permute.xlu1 %1330  ;;  %v1328_v26 = vpop.permute.xlu0 %1327 }
 0x26b   : > { %v1342_v62 = vsel %vm187_vm3, %v1341_v63, %v1328_v26 }
 0x26c   : > { %v1343_v29 = vsel %vm189_vm4, %v1342_v62, %v1331_v5 }
 0x26e   : > { %v1337_v8 = vpop.permute.xlu1 %1336  ;;  %v1334_v42 = vpop.permute.xlu0 %1333 }
 0x26f   : > { %v1344_v49 = vsel %vm191_vm5, %v1343_v29, %v1334_v42 }
 0x270   : > { %v1345_v15 = vsel %vm193_vm6, %v1344_v49, %v1337_v8 }
 0x271   : > { %v1351_v20 = vmul.f32 %v1731_v17, %v1345_v15 }
 0x272   : > { %v1392_v36 = vpop.permute.xlu1 %1391  ;;  %v1354_v10 = vpop.permute.xlu0 %1353 }
 0x273   : > { %v3514_v28 = vadd.f32 %v1351_v20, %v1199_v40 }
 0x276   : > { %v1430_v0 = vpop.permute.xlu1 %1429  ;;  %v1395_v1 = vpop.permute.xlu0 %1394 }
 0x277   : > { %v1415_v13 = vsel %vm181_vm0, %v1392_v36, %v1395_v1 }
 0x27a   : > { %v1398_v58 = vpop.permute.xlu1 %1397  ;;  %v1433_v55 = vpop.permute.xlu0 %1432 }
 0x27b   : > { %v1453_v21 = vsel %vm181_vm0, %v1430_v0, %v1433_v55  ;;  %v1416_v41 = vsel %vm183_vm1, %v1415_v13, %v1398_v58 }
 0x27e   : > { %v1357_v31 = vpop.permute.xlu1 %1356  ;;  %v1436_v32 = vpop.permute.xlu0 %1435 }
 0x27f   : > { %v1454_v30 = vsel %vm183_vm1, %v1453_v21, %v1436_v32  ;;  %v1377_v17 = vsel %vm181_vm0, %v1354_v10, %v1357_v31 }
 0x282   : > { %v1439_v22 = vpop.permute.xlu1 %1438  ;;  %v1401_v33 = vpop.permute.xlu0 %1400 }
 0x283   : > { %v1455_v34 = vsel %vm185_vm2, %v1454_v30, %v1439_v22  ;;  %v1417_v3 = vsel %vm185_vm2, %v1416_v41, %v1401_v33  ;;  %v1735_v33 = vld [vmem:[%s3630_s1 + $0x22] ss:$0 sm:$0xff] }
 0x286   : > { %v1471_v16 = vpop.permute.xlu1 %1470  ;;  %v1468_v14 = vpop.permute.xlu0 %1467 }
 0x287   : > { %v1491_v20 = vsel %vm181_vm0, %v1468_v14, %v1471_v16 }
 0x28a   : > { %v1404_v35 = vpop.permute.xlu1 %1403  ;;  %v1360_v39 = vpop.permute.xlu0 %1359 }
 0x28b   : > { %v1418_v24 = vsel %vm187_vm3, %v1417_v3, %v1404_v35  ;;  %v1378_v42 = vsel %vm183_vm1, %v1377_v17, %v1360_v39 }
 0x28e   : > { %v1474_v46 = vpop.permute.xlu1 %1473  ;;  %v1442_v56 = vpop.permute.xlu0 %1441 }
 0x28f   : > { %v1456_v48 = vsel %vm187_vm3, %v1455_v34, %v1442_v56 }
 0x292   : > { %v1407_v47 = vpop.permute.xlu1 %1406  ;;  %v1363_v45 = vpop.permute.xlu0 %1362 }
 0x293   : > { %v1419_v53 = vsel %vm189_vm4, %v1418_v24, %v1407_v47  ;;  %v1379_v15 = vsel %vm185_vm2, %v1378_v42, %v1363_v45 }
 0x296   : > { %v1477_v54 = vpop.permute.xlu1 %1476  ;;  %v1445_v11 = vpop.permute.xlu0 %1444 }
 0x297   : > { %v1457_v9 = vsel %vm189_vm4, %v1456_v48, %v1445_v11 }
 0x29a   : > { %v1509_v25 = vpop.permute.xlu1 %1508  ;;  %v1506_v23 = vpop.permute.xlu0 %1505 }
 0x29b   : > { %v1529_v16 = vsel %vm181_vm0, %v1506_v23, %v1509_v25 }
 0x29e   : > { %v1410_v57 = vpop.permute.xlu1 %1409  ;;  %v1366_v4 = vpop.permute.xlu0 %1365 }
 0x29f   : > { %v1420_v63 = vsel %vm191_vm5, %v1419_v53, %v1410_v57  ;;  %v1380_v40 = vsel %vm187_vm3, %v1379_v15, %v1366_v4 }
 0x2a2   : > { %v1480_v12 = vpop.permute.xlu1 %1479  ;;  %v1448_v38 = vpop.permute.xlu0 %1447 }
 0x2a3   : > { %v1458_v59 = vsel %vm191_vm5, %v1457_v9, %v1448_v38 }
 0x2a6   : > { %v1369_v6 = vpop.permute.xlu1 %1368  ;;  %v1512_v43 = vpop.permute.xlu0 %1511 }
 0x2a7   : > { %v1381_v36 = vsel %vm189_vm4, %v1380_v40, %v1369_v6  ;;  %v1530_v56 = vsel %vm183_vm1, %v1529_v16, %v1512_v43 }
 0x2aa   : > { %v1451_v51 = vpop.permute.xlu1 %1450  ;;  %v1413_v19 = vpop.permute.xlu0 %1412 }
 0x2ab   : > { %v1459_v5 = vsel %vm193_vm6, %v1458_v59, %v1451_v51  ;;  %v1421_v26 = vsel %vm193_vm6, %v1420_v63, %v1413_v19 }
 0x2ac   : > { %v1465_v44 = vmul.f32 %v1734_v50, %v1459_v5  ;;  %v1427_v27 = vmul.f32 %v1733_v60, %v1421_v26 }
 0x2ae   : > { %v1466_v62 = vadd.f32 %v1465_v44, %v3480_v7  ;;  %v1428_v29 = vadd.f32 %v1427_v27, %v3366_v52  ;;  %v1515_v2 = vpop.permute.xlu1 %1514  ;;  %v1483_v18 = vpop.permute.xlu0 %1482  ;;  %v1732_v52 = vld [vmem:[%s3630_s1 + $0x1f] ss:$0 sm:$0xff]  ;;  %v1492_v7 = vsel %vm183_vm1, %v1491_v20, %v1474_v46 }
 0x2af   : > { %v1493_v58 = vsel %vm185_vm2, %v1492_v7, %v1477_v54  ;;  %v1531_v45 = vsel %vm185_vm2, %v1530_v56, %v1515_v2 }
 0x2b0   : > { %v1543_v8 = vadd.f32 %v1466_v62, %v1428_v29  ;;  %v1494_v31 = vsel %vm187_vm3, %v1493_v58, %v1480_v12 }
 0x2b1   : > { %v1495_v22 = vsel %vm189_vm4, %v1494_v31, %v1483_v18 }
 0x2b2   : > { %v1486_v61 = vpop.permute.xlu1 %1485  ;;  %v1372_v49 = vpop.permute.xlu0 %1371 }
 0x2b3   : > { %v1382_v10 = vsel %vm191_vm5, %v1381_v36, %v1372_v49  ;;  %v1496_v14 = vsel %vm191_vm5, %v1495_v22, %v1486_v61 }
 0x2b6   : > { %v1375_v0 = vpop.permute.xlu1 %1374  ;;  %v1518_v1 = vpop.permute.xlu0 %1517 }
 0x2b7   : > { %v1383_v55 = vsel %vm193_vm6, %v1382_v10, %v1375_v0  ;;  %v1532_v11 = vsel %vm187_vm3, %v1531_v45, %v1518_v1 }
 0x2b8   : > { %v1389_v32 = vmul.f32 %v1732_v52, %v1383_v55 }
 0x2ba   : > { %v1390_v35 = vadd.f32 %v1389_v32, %v3242_v37  ;;  %v1521_v39 = vpop.permute.xlu1 %1520  ;;  %v1489_v46 = vpop.permute.xlu0 %1488  ;;  %v1736_v37 = vld [vmem:[%s3630_s1 + $0x23] ss:$0 sm:$0xff] }
 0x2bb   : > { %v1497_v47 = vsel %vm193_vm6, %v1496_v14, %v1489_v46  ;;  %v1533_v25 = vsel %vm189_vm4, %v1532_v11, %v1521_v39 }
 0x2bc   : > { %v1503_v54 = vmul.f32 %v1735_v33, %v1497_v47 }
 0x2be   : > { %v1504_v23 = vadd.f32 %v1503_v54, %v3514_v28  ;;  %v1524_v57 = vpop.permute.xlu0 %1523  ;;  %v1527_v4 = vpop.permute.xlu1 %1526 }
 0x2bf   : > { %v1534_v12 = vsel %vm191_vm5, %v1533_v25, %v1524_v57 }
 0x2c0   : > { %v1544_v38 = vadd.f32 %v1543_v8, %v1504_v23  ;;  %v1535_v13 = vsel %vm193_vm6, %v1534_v12, %v1527_v4 }
 0x2c1   : > { %v1541_v21 = vmul.f32 %v1736_v37, %v1535_v13 }
 0x2c3   : > { %v1542_v41 = vadd.f32 %v1541_v21, %v1390_v35 }
 0x2c5   : > { %v1545_v28 = vadd.f32 %v1544_v38, %v1542_v41 }
 0x2c7   : > { %v1546_v30 = vmax.f32 %v1545_v28, 0.0 }
 0x2c9   : > { %1547 = vst [vmem:[%s150_s17] sm:$0xff] %v1546_v30 }
 0x2ca   : > { %1854 = shalt.err (!%p1851_p6)
}
 0x2cb   : > { %s1855_s26 = scalar_lea.hbm %s3576_s20, 128  ;;  %s1859_s9 = scalar_lea.hbm %s3631_s2, 512 }
 0x2cc   : > { %p1856_p7 = scmp.ne.s32.totalorder %s3576_s20, %s1855_s26  ;;  %p1860_p11 = scmp.lt.u32.totalorder %s3576_s20, %s3631_s2 }
 0x2cd   : > { %p1861_p12 = scmp.lt.u32.totalorder %s1859_s9, %s1855_s26  ;;  %p1863_p0 = scmp.lt.u32.totalorder %s1855_s26, %s3576_s20 }
 0x2ce   : > { %p1857_p9 = pnand %p1856_p7, %p2027_p3 }
 0x2cf   : > { %p1862_p13 = por %p1861_p12, %p1860_p11 }
 0x2d0   : > { %p1858_p10 = pneg %p1857_p9 }
 0x2d1   : > { %p1864_p1 = por %p1863_p0, %p1862_p13 }
 0x2d3   : > { %p1865_p2 = pnand %p1864_p1, %p1858_p10 }
 0x2d5   : > { %1868 = shalt.err (!%p1865_p2)
}
 0x2d6   : > { %1743 = dma.vmem_to_hbm [thread:$0]  (%p2027_p3), %s3578_s3, 128, %s3576_s20, %s1549_s13  }
 0x2d7 PF: > { %s3985_s14 = sld [smem:[#allocation5_spill]]  ;;  %p1749_p4 = scmp.ge.s32.totalorder %s1935_s16, 2 }
 0x2d9   : > { %p1746_p5 = pnand %p1749_p4, %p2036_p8 }
 0x2dd   : > { %s1576_s15 = sand.u32 1, %s3985_s14  }
 0x2de   : > { %s1577_s28 = scalar_lea.sflag [#allocation3], %s1576_s15 }
 0x2df   : > { %1902 = dma.done.wait (!%p1746_p5), %s1577_s28, 128  }
 0x2e0   : > { %1904 = vsyncadd (!%p1746_p5), %s1577_s28, 4294967168  ;;  %s15_s16 = sadd.s32 1, %s1935_s16   ;;  %s3987_s30 = sld [smem:[#allocation6_spill]] }
 0x2e1   : > { %p12_p6 = scmp.ge.s32.totalorder %s15_s16, 6   ;;  %s3988_s11 = sld [smem:[#allocation12_spill]] }
 0x2e2   : > { %s3989_s12 = sld [smem:[#allocation7_spill]]  ;;  %s3990_s13 = sld [smem:[#allocation8_spill]] }
 0x2e3   : > { %s3991_s14 = sld [smem:[#allocation9_spill]]  ;;  %s3992_s15 = sld [smem:[#allocation10_spill]] }
 0x2e4   : > { %s3993_s9 = smov %s1911_s10  ;;  %14 = sbr.rel (!%p12_p6) target bundleno = 7 (0x7), region = 75 }
 0x2e6   : > { %s3994_s10 = smov %s3987_s30 }
 0x2eb   :  { %1582 = vsyncpa [#allocation3], 1 }
 0x2ec   :  { %1584 = vsyncpa [#allocation3 + $0x1], 1 }

</bundles_post_ra>
